<compile_context>
chip_gen: v6e
topology: v6e:2x2x1
jax: 0.10.0
libtpu: 0.0.40
codegen_flags: <defaults>
</compile_context>

<pallas_src>
import math

import jax
import jax.numpy as jnp
from jax.experimental import pallas as pl
from jax.experimental.pallas import tpu as pltpu

# ------------------------------ config ---------------------------------------
D_MODEL = 32
NHEAD = 4
HEAD_DIM = D_MODEL // NHEAD
DIM_FF = 64
MAX_RANGE = 4
LT = 8          # target sequence length
LS = 10         # graph-memory sequence length
BATCH = 2
EPS = 1e-6
_INV_SQRT2 = 1.0 / math.sqrt(2.0)


# --------------------------- in-kernel helpers --------------------------------
def _layernorm(x, gamma, beta):
    # LayerNorm over last dim, eps=1e-6 (matches torch.nn.LayerNorm).
    mu = jnp.mean(x, axis=-1, keepdims=True)
    var = jnp.mean((x - mu) ** 2, axis=-1, keepdims=True)
    return (x - mu) * jax.lax.rsqrt(var + EPS) * gamma + beta


def _erf_approx(x):
    # Abramowitz & Stegun 7.1.26, |err| <= 1.5e-7 -> exact at f32 level.
    # Cost is negligible here: the FFN hidden is only ~2 vregs of data.
    a1, a2, a3, a4, a5 = 0.254829592, -0.284496736, 1.421413741, -1.453152027, 1.061405429
    p = 0.3275911
    sgn = jnp.where(x >= 0.0, 1.0, -1.0)
    ax = jnp.abs(x)
    t = 1.0 / (1.0 + p * ax)
    y = 1.0 - (((((a5 * t + a4) * t) + a3) * t + a2) * t + a1) * t * jnp.exp(-ax * ax)
    return sgn * y


def _gelu_exact(x):
    # Exact (erf) GELU, i.e. PyTorch F.gelu default.
    return 0.5 * x * (1.0 + _erf_approx(x * _INV_SQRT2))


def _attn_block(qb, kb, vb, bias, head_mask):
    """All-heads attention for one batch element using the head-stacking trick.

    qb: (Lq, E) pre-scaled query rows, kb/vb: (Lk, E).
    head_mask: (H*Lq, E) 0/1 matrix; row block h keeps only head-h feature columns.
    bias: optional (H*Lq, Lk) additive logit bias.
    Returns (ctx (Lq, E) concat-head context, att (Lq, Lk) head-averaged weights).
    One score matmul, one softmax pass, one value matmul for all heads: no
    sub-vreg lane slicing, no per-head softmax reductions.
    """
    lq, e = qb.shape
    nh = head_mask.shape[0] // lq

    qs = jnp.tile(qb, (nh, 1)) * head_mask                           # (H*Lq, E)
    s = jax.lax.dot_general(qs, kb, (((1,), (1,)), ((), ())),
                            preferred_element_type=jnp.float32)      # (H*Lq, Lk)
    if bias is not None:
        s = s + bias
    s = s - jnp.max(s, axis=-1, keepdims=True)
    p = jnp.exp(s)
    p = p / jnp.sum(p, axis=-1, keepdims=True)                       # exact softmax
    ob = jnp.dot(p, vb, preferred_element_type=jnp.float32) * head_mask  # (H*Lq, E)

    ctx = ob[0:lq, :]
    att = p[0:lq, :]
    for h in range(1, nh):                                           # static, tiny
        ctx = ctx + ob[h * lq:(h + 1) * lq, :]
        att = att + p[h * lq:(h + 1) * lq, :]
    return ctx, att * (1.0 / nh)


# ------------------------------ fused kernel -----------------------------------
def _fused_decoder_kernel(
    tgt_ref, mem_ref, relb_ref, hmask_ref,
    sa_wqkv_ref, sa_bqkv_ref, sa_wo_ref, sa_bo_ref, ln1_g_ref, ln1_b_ref,
    ca_wq_ref, ca_bq_ref, ca_wkv_ref, ca_bkv_ref, ca_wo_ref, ca_bo_ref,
    ln3_g_ref, ln3_b_ref,
    ff_w1_ref, ff_b1_ref, ff_w2_ref, ff_b2_ref, ln4_g_ref, ln4_b_ref,
    out_tgt_ref, out_inter_ref, out_att_ref, loss_ref, pen_ref,
):
    lt, n, e = tgt_ref.shape
    ls = mem_ref.shape[0]
    head_mask = hmask_ref[...]                                       # (H*Lt, E)
    nh = head_mask.shape[0] // lt
    scale = 1.0 / math.sqrt(e // nh)

    # ---- seq-first -> batch-major 2-D slab (all in VMEM / vregs) ----
    x3 = tgt_ref[...]                                                # (Lt, N, E)
    m3 = mem_ref[...]                                                # (Ls, N, E)
    x2d = jnp.concatenate([x3[:, b, :] for b in range(n)], axis=0)   # (N*Lt, E)

    # ---- self-attention (fused QKV, batch folded into M) + norm1 ----
    qkv = jnp.dot(x2d, sa_wqkv_ref[...],
                  preferred_element_type=jnp.float32) + sa_bqkv_ref[...]   # (N*Lt, 3E)
    q_s = qkv[:, 0:e] * scale
    k_s = qkv[:, e:2 * e]
    v_s = qkv[:, 2 * e:3 * e]
    relb = relb_ref[...]                                             # (H*Lt, Lt)
    ctxs = []
    for b in range(n):                                               # static, N=2
        rows = slice(b * lt, (b + 1) * lt)
        ctx_b, _ = _attn_block(q_s[rows, :], k_s[rows, :], v_s[rows, :],
                               relb, head_mask)
        ctxs.append(ctx_b)
    ctx_s = jnp.concatenate(ctxs, axis=0)                            # (N*Lt, E)
    sa_out = jnp.dot(ctx_s, sa_wo_ref[...],
                     preferred_element_type=jnp.float32) + sa_bo_ref[...]
    t1 = _layernorm(x2d + sa_out, ln1_g_ref[...], ln1_b_ref[...])    # dropout1 = id

    # ---- cross-attention (fused KV) + norm3 ----
    q_c = (jnp.dot(t1, ca_wq_ref[...],
                   preferred_element_type=jnp.float32) + ca_bq_ref[...]) * scale
    ctxs = []
    atts = []
    for b in range(n):
        mb = m3[:, b, :]                                             # (Ls, E)
        kvb = jnp.dot(mb, ca_wkv_ref[...],
                      preferred_element_type=jnp.float32) + ca_bkv_ref[...]  # (Ls, 2E)
        ctx_b, att_b = _attn_block(q_c[b * lt:(b + 1) * lt, :],
                                   kvb[:, 0:e], kvb[:, e:2 * e],
                                   None, head_mask)
        ctxs.append(ctx_b)
        atts.append(att_b)                                           # (Lt, Ls)
    ctx_c = jnp.concatenate(ctxs, axis=0)
    ca_out = jnp.dot(ctx_c, ca_wo_ref[...],
                     preferred_element_type=jnp.float32) + ca_bo_ref[...]
    inter = ca_out + t1                         # dropout3 = id, gate=None, multiplier=None
    t2 = _layernorm(inter, ln3_g_ref[...], ln3_b_ref[...])           # norm3

    # ---- feed-forward + norm4 ----
    hid = jnp.dot(t2, ff_w1_ref[...],
                  preferred_element_type=jnp.float32) + ff_b1_ref[...]
    hid = _gelu_exact(hid)                                           # activation='gelu'
    y = jnp.dot(hid, ff_w2_ref[...],
                preferred_element_type=jnp.float32) + ff_b2_ref[...]
    t3 = _layernorm(t2 + y, ln4_g_ref[...], ln4_b_ref[...])          # norm4

    # ---- coverage statistics (attention map is still in registers) ----
    a_g3 = jnp.concatenate([a[None] for a in atts], axis=0)          # (N, Lt, Ls)
    out_att_ref[...] = a_g3

    ri = jax.lax.broadcasted_iota(jnp.int32, (lt, lt), 0)
    ci = jax.lax.broadcasted_iota(jnp.int32, (lt, lt), 1)
    tril = (ci <= ri).astype(jnp.float32)                            # inclusive cumsum
    ws_total = 0.0
    max_total = 0.0
    for b in range(n):
        ab = atts[b]                                                 # (Lt, Ls)
        cum = jnp.dot(tril, ab, preferred_element_type=jnp.float32)
        ws_total = ws_total + jnp.sum(jnp.where(ab < cum, ab, cum))
        max_total = max_total + jnp.sum(jnp.max(ab, axis=0, keepdims=True))
    loss = ws_total / (n * lt) - max_total / (n * ls)
    loss_ref[...] = loss * jnp.ones((1, 1), jnp.float32)

    agg = jnp.sum(a_g3, axis=1)                                      # (N, Ls)
    pen_ref[...] = jnp.sum(jnp.log(jnp.minimum(agg, 1.0)), axis=1, keepdims=True)

    # ---- final outputs (batch-first; wrapper transposes the 2 KB results) ----
    out_tgt_ref[...] = jnp.concatenate(
        [t3[b * lt:(b + 1) * lt, :][None] for b in range(n)], axis=0)
    out_inter_ref[...] = jnp.concatenate(
        [inter[b * lt:(b + 1) * lt, :][None] for b in range(n)], axis=0)


# ----------------------------- host-side wrapper --------------------------------
def _build_rel_bias(rel_pos_embed, lt):
    # rel_pos_embed: (2*MAX_RANGE+1, NHEAD).  bias[h, i, j] = table[clip(j-i)+R, h]
    rel = jnp.arange(lt)[None, :] - jnp.arange(lt)[:, None]
    idx = jnp.clip(rel, -MAX_RANGE, MAX_RANGE) + MAX_RANGE
    return jnp.transpose(rel_pos_embed[idx], (2, 0, 1)).astype(jnp.float32)  # (H, Lt, Lt)


@jax.jit
def copycat_decoder_layer_forward(target, graph_memory, params):
    """target: (Lt, N, E), graph_memory: (Ls, N, E).  Returns the 5-tuple of forward()."""
    lt, n, e = target.shape
    ls = graph_memory.shape[0]

    # Head-stacked relative-position bias (H*Lt, Lt) and head block mask (H*Lt, E);
    # both constant-folded by XLA under jit.
    relb = _build_rel_bias(params["rel_pos_embed"], lt).reshape(NHEAD * lt, lt)
    head_rows = jnp.repeat(jnp.arange(NHEAD), lt)
    head_cols = jnp.repeat(jnp.arange(NHEAD), e // NHEAD)
    head_mask = (head_rows[:, None] == head_cols[None, :]).astype(jnp.float32)

    out_shape = (
        jax.ShapeDtypeStruct((n, lt, e), jnp.float32),    # target (batch-first)
        jax.ShapeDtypeStruct((n, lt, e), jnp.float32),    # intermediate (batch-first)
        jax.ShapeDtypeStruct((n, lt, ls), jnp.float32),   # head-averaged attention a_g
        jax.ShapeDtypeStruct((1, 1), jnp.float32),        # coverage loss
        jax.ShapeDtypeStruct((n, 1), jnp.float32),        # coverage penalty
    )
    t3, inter, a_g, cov_loss, cov_pen = pl.pallas_call(
        _fused_decoder_kernel,
        out_shape=out_shape,
        cost_estimate=pl.CostEstimate(flops=600_000, transcendentals=2_500,
                                      bytes_accessed=60_000),
    )(target, graph_memory, relb, head_mask,
      params["sa_wqkv"], params["sa_bqkv"], params["sa_wo"], params["sa_bo"],
      params["ln1_g"], params["ln1_b"],
      params["ca_wq"], params["ca_bq"], params["ca_wkv"], params["ca_bkv"],
      params["ca_wo"], params["ca_bo"], params["ln3_g"], params["ln3_b"],
      params["ff_w1"], params["ff_b1"], params["ff_w2"], params["ff_b2"],
      params["ln4_g"], params["ln4_b"])

    return (jnp.transpose(t3, (1, 0, 2)),
            jnp.transpose(inter, (1, 0, 2)),
            a_g,
            cov_loss[0, 0],
            cov_pen[:, 0])


# ------------------------- parameters (deterministic) --------------------------
def init_params(key):
    ks = jax.random.split(key, 32)
    it = iter(range(32))

    def mat(shape, fan_in):
        return (jax.random.normal(ks[next(it)], shape, jnp.float32)
                / math.sqrt(fan_in)).astype(jnp.float32)

    def vec(shape, scale=0.02):
        return (scale * jax.random.normal(ks[next(it)], shape, jnp.float32)).astype(jnp.float32)

    p = {}
    # attention projections stored as (E, E) for x @ W
    for pre in ("sa", "ca"):
        p[f"{pre}_wq"] = mat((D_MODEL, D_MODEL), D_MODEL)
        p[f"{pre}_bq"] = vec((1, D_MODEL))
        p[f"{pre}_wk"] = mat((D_MODEL, D_MODEL), D_MODEL)
        p[f"{pre}_bk"] = vec((1, D_MODEL))
        p[f"{pre}_wv"] = mat((D_MODEL, D_MODEL), D_MODEL)
        p[f"{pre}_bv"] = vec((1, D_MODEL))
        p[f"{pre}_wo"] = mat((D_MODEL, D_MODEL), D_MODEL)
        p[f"{pre}_bo"] = vec((1, D_MODEL))
    # relative position embedding table (2*max_range+1, nhead)
    p["rel_pos_embed"] = vec((2 * MAX_RANGE + 1, NHEAD), scale=0.1)
    # feed-forward
    p["ff_w1"] = mat((D_MODEL, DIM_FF), D_MODEL)
    p["ff_b1"] = vec((1, DIM_FF))
    p["ff_w2"] = mat((DIM_FF, D_MODEL), DIM_FF)
    p["ff_b2"] = vec((1, D_MODEL))
    # layer norms used by forward(): norm1, norm3, norm4
    for name in ("ln1", "ln3", "ln4"):
        p[f"{name}_g"] = 1.0 + vec((1, D_MODEL), scale=0.1)
        p[f"{name}_b"] = vec((1, D_MODEL), scale=0.1)

    # pre-packed fused projections (built once, outside the kernel)
    p["sa_wqkv"] = jnp.concatenate([p["sa_wq"], p["sa_wk"], p["sa_wv"]], axis=1)  # (E, 3E)
    p["sa_bqkv"] = jnp.concatenate([p["sa_bq"], p["sa_bk"], p["sa_bv"]], axis=1)  # (1, 3E)
    p["ca_wkv"] = jnp.concatenate([p["ca_wk"], p["ca_wv"]], axis=1)               # (E, 2E)
    p["ca_bkv"] = jnp.concatenate([p["ca_bk"], p["ca_bv"]], axis=1)               # (1, 2E)
    return p


# ------------------------- plain-JAX reference (for checking) ------------------
_HI = jax.lax.Precision.HIGHEST


def _ln_ref(x, g, b):
    mu = x.mean(-1, keepdims=True)
    var = ((x - mu) ** 2).mean(-1, keepdims=True)
    return (x - mu) * jax.lax.rsqrt(var + EPS) * g + b


def _mha_ref_single(q_in, kv_in, wq, bq, wk, bk, wv, bv, wo, bo, bias):
    q = jnp.dot(q_in, wq, precision=_HI) + bq[0]
    k = jnp.dot(kv_in, wk, precision=_HI) + bk[0]
    v = jnp.dot(kv_in, wv, precision=_HI) + bv[0]
    lq, lk = q_in.shape[0], kv_in.shape[0]
    q = q.reshape(lq, NHEAD, HEAD_DIM)
    k = k.reshape(lk, NHEAD, HEAD_DIM)
    v = v.reshape(lk, NHEAD, HEAD_DIM)
    s = jnp.einsum("qhd,khd->hqk", q, k, precision=_HI) / math.sqrt(HEAD_DIM)
    if bias is not None:
        s = s + bias
    p = jax.nn.softmax(s, axis=-1)
    o = jnp.einsum("hqk,khd->qhd", p, v, precision=_HI).reshape(lq, D_MODEL)
    return jnp.dot(o, wo, precision=_HI) + bo[0], p.mean(0)


def reference_forward(target, graph_memory, p):
    x = jnp.transpose(target, (1, 0, 2))
    mem = jnp.transpose(graph_memory, (1, 0, 2))
    rel_bias = _build_rel_bias(p["rel_pos_embed"], x.shape[1])

    sa_out, _ = jax.vmap(lambda q: _mha_ref_single(
        q, q, p["sa_wq"], p["sa_bq"], p["sa_wk"], p["sa_bk"],
        p["sa_wv"], p["sa_bv"], p["sa_wo"], p["sa_bo"], rel_bias))(x)
    t1 = _ln_ref(x + sa_out, p["ln1_g"][0], p["ln1_b"][0])

    ca_out, att = jax.vmap(lambda q, kv: _mha_ref_single(
        q, kv, p["ca_wq"], p["ca_bq"], p["ca_wk"], p["ca_bk"],
        p["ca_wv"], p["ca_bv"], p["ca_wo"], p["ca_bo"], None))(t1, mem)
    inter = ca_out + t1
    t2 = _ln_ref(inter, p["ln3_g"][0], p["ln3_b"][0])

    cum = jnp.cumsum(att, axis=1)
    max_att = jnp.max(att, axis=1).mean()
    cov_loss = jnp.where(att < cum, att, cum).sum(axis=2).mean() - max_att
    agg = att.sum(axis=1)
    cov_pen = jnp.log(jnp.minimum(agg, 1.0)).sum(axis=1)

    h = jnp.dot(t2, p["ff_w1"], precision=_HI) + p["ff_b1"][0]
    h = jax.nn.gelu(h, approximate=False)
    y = jnp.dot(h, p["ff_w2"], precision=_HI) + p["ff_b2"][0]
    t3 = _ln_ref(t2 + y, p["ln4_g"][0], p["ln4_b"][0])

    return (jnp.transpose(t3, (1, 0, 2)), jnp.transpose(inter, (1, 0, 2)),
            att, cov_loss, cov_pen)


# ----------------------------------- main --------------------------------------
if __name__ == "__main__":
    key = jax.random.PRNGKey(0)
    k_params, k_tgt, k_mem = jax.random.split(key, 3)
    params = init_params(k_params)

    target = jax.random.normal(k_tgt, (LT, BATCH, D_MODEL), jnp.float32)
    graph_memory = jax.random.normal(k_mem, (LS, BATCH, D_MODEL), jnp.float32)

    outs = copycat_decoder_layer_forward(target, graph_memory, params)
    outs = jax.block_until_ready(outs)

    refs = reference_forward(target, graph_memory, params)
    names = ("target", "intermediate", "a_g", "coverage_loss", "coverage_penalty")
    for name, o, r in zip(names, outs, refs):
        assert bool(jnp.all(jnp.isfinite(o))), f"non-finite output in {name}"
        assert bool(jnp.allclose(o, r, rtol=1e-2, atol=1e-3)), (
            f"{name} mismatch, max abs err = {float(jnp.abs(o - r).max())}")

    print("KERNEL_OK")
</pallas_src>

<mosaic_0001>
module attributes {stable_mosaic.version = 11 : i64} {
  func.func @_fused_decoder_kernel(%arg0: memref<8x2x32xf32, #tpu.memory_space<vmem>>, %arg1: memref<10x2x32xf32, #tpu.memory_space<vmem>>, %arg2: memref<32x8xf32, #tpu.memory_space<vmem>>, %arg3: memref<32x32xf32, #tpu.memory_space<vmem>>, %arg4: memref<32x96xf32, #tpu.memory_space<vmem>>, %arg5: memref<1x96xf32, #tpu.memory_space<vmem>>, %arg6: memref<32x32xf32, #tpu.memory_space<vmem>>, %arg7: memref<1x32xf32, #tpu.memory_space<vmem>>, %arg8: memref<1x32xf32, #tpu.memory_space<vmem>>, %arg9: memref<1x32xf32, #tpu.memory_space<vmem>>, %arg10: memref<32x32xf32, #tpu.memory_space<vmem>>, %arg11: memref<1x32xf32, #tpu.memory_space<vmem>>, %arg12: memref<32x64xf32, #tpu.memory_space<vmem>>, %arg13: memref<1x64xf32, #tpu.memory_space<vmem>>, %arg14: memref<32x32xf32, #tpu.memory_space<vmem>>, %arg15: memref<1x32xf32, #tpu.memory_space<vmem>>, %arg16: memref<1x32xf32, #tpu.memory_space<vmem>>, %arg17: memref<1x32xf32, #tpu.memory_space<vmem>>, %arg18: memref<32x64xf32, #tpu.memory_space<vmem>>, %arg19: memref<1x64xf32, #tpu.memory_space<vmem>>, %arg20: memref<64x32xf32, #tpu.memory_space<vmem>>, %arg21: memref<1x32xf32, #tpu.memory_space<vmem>>, %arg22: memref<1x32xf32, #tpu.memory_space<vmem>>, %arg23: memref<1x32xf32, #tpu.memory_space<vmem>>, %arg24: memref<2x8x32xf32, #tpu.memory_space<vmem>>, %arg25: memref<2x8x32xf32, #tpu.memory_space<vmem>>, %arg26: memref<2x8x10xf32, #tpu.memory_space<vmem>>, %arg27: memref<1x1xf32, #tpu.memory_space<vmem>>, %arg28: memref<2x1xf32, #tpu.memory_space<vmem>>) attributes {dimension_semantics = [], scalar_prefetch = 0 : i64, scratch_operands = 0 : i64, tpu.core_type = #tpu.core_type<tc>} {
    %c0 = arith.constant 0 : index
    %c0_0 = arith.constant 0 : index
    %0 = vector.load %arg3[%c0, %c0_0] : memref<32x32xf32, #tpu.memory_space<vmem>>, vector<32x32xf32>
    %c0_1 = arith.constant 0 : index
    %c0_2 = arith.constant 0 : index
    %c0_3 = arith.constant 0 : index
    %1 = vector.load %arg0[%c0_1, %c0_2, %c0_3] : memref<8x2x32xf32, #tpu.memory_space<vmem>>, vector<8x2x32xf32>
    %c0_4 = arith.constant 0 : index
    %c0_5 = arith.constant 0 : index
    %c0_6 = arith.constant 0 : index
    %2 = vector.load %arg1[%c0_4, %c0_5, %c0_6] : memref<10x2x32xf32, #tpu.memory_space<vmem>>, vector<10x2x32xf32>
    %3 = vector.extract_strided_slice %1 {offsets = [0, 0, 0], sizes = [8, 1, 32], strides = [1, 1, 1]} : vector<8x2x32xf32> to vector<8x1x32xf32>
    %4 = vector.shape_cast %3 : vector<8x1x32xf32> to vector<8x32xf32>
    %5 = vector.extract_strided_slice %1 {offsets = [0, 1, 0], sizes = [8, 1, 32], strides = [1, 1, 1]} : vector<8x2x32xf32> to vector<8x1x32xf32>
    %6 = vector.shape_cast %5 : vector<8x1x32xf32> to vector<8x32xf32>
    %7 = tpu.concatenate %4, %6 in 0 : vector<8x32xf32>, vector<8x32xf32> -> vector<16x32xf32>
    %c0_7 = arith.constant 0 : index
    %c0_8 = arith.constant 0 : index
    %8 = vector.load %arg4[%c0_7, %c0_8] : memref<32x96xf32, #tpu.memory_space<vmem>>, vector<32x96xf32>
    %cst = arith.constant dense<0.000000e+00> : vector<16x96xf32>
    %9 = tpu.matmul %7, %8, %cst {dimension_numbers = #tpu.dot_dimension_numbers<[1], [0], [0], [1], [0, 0, 1, 1], [], []>} : vector<16x32xf32>, vector<32x96xf32>, vector<16x96xf32> -> vector<16x96xf32>
    %c0_9 = arith.constant 0 : index
    %c0_10 = arith.constant 0 : index
    %10 = vector.load %arg5[%c0_9, %c0_10] : memref<1x96xf32, #tpu.memory_space<vmem>>, vector<1x96xf32>
    %11 = vector.broadcast %10 : vector<1x96xf32> to vector<16x96xf32>
    %12 = arith.addf %9, %11 : vector<16x96xf32>
    %13 = vector.extract_strided_slice %12 {offsets = [0, 0], sizes = [16, 32], strides = [1, 1]} : vector<16x96xf32> to vector<16x32xf32>
    %cst_11 = arith.constant 0.353553385 : f32
    %14 = vector.broadcast %cst_11 : f32 to vector<16x32xf32>
    %15 = arith.mulf %13, %14 : vector<16x32xf32>
    %16 = vector.extract_strided_slice %12 {offsets = [0, 32], sizes = [16, 32], strides = [1, 1]} : vector<16x96xf32> to vector<16x32xf32>
    %17 = vector.extract_strided_slice %12 {offsets = [0, 64], sizes = [16, 32], strides = [1, 1]} : vector<16x96xf32> to vector<16x32xf32>
    %c0_12 = arith.constant 0 : index
    %c0_13 = arith.constant 0 : index
    %18 = vector.load %arg2[%c0_12, %c0_13] : memref<32x8xf32, #tpu.memory_space<vmem>>, vector<32x8xf32>
    %19 = vector.extract_strided_slice %15 {offsets = [0, 0], sizes = [8, 32], strides = [1, 1]} : vector<16x32xf32> to vector<8x32xf32>
    %20 = vector.extract_strided_slice %16 {offsets = [0, 0], sizes = [8, 32], strides = [1, 1]} : vector<16x32xf32> to vector<8x32xf32>
    %21 = vector.extract_strided_slice %17 {offsets = [0, 0], sizes = [8, 32], strides = [1, 1]} : vector<16x32xf32> to vector<8x32xf32>
    %22 = tpu.concatenate %19, %19, %19, %19 in 0 : vector<8x32xf32>, vector<8x32xf32>, vector<8x32xf32>, vector<8x32xf32> -> vector<32x32xf32>
    %23 = arith.mulf %22, %0 : vector<32x32xf32>
    %cst_14 = arith.constant dense<0.000000e+00> : vector<32x8xf32>
    %24 = tpu.matmul %23, %20, %cst_14 {dimension_numbers = #tpu.dot_dimension_numbers<[1], [1], [0], [0], [0, 0, 1, 0], [], []>} : vector<32x32xf32>, vector<8x32xf32>, vector<32x8xf32> -> vector<32x8xf32>
    %25 = arith.addf %24, %18 : vector<32x8xf32>
    %cst_15 = arith.constant dense<0xFF800000> : vector<32xf32>
    %26 = vector.multi_reduction <maximumf>, %25, %cst_15 [1] : vector<32x8xf32> to vector<32xf32>
    %27 = vector.shape_cast %26 : vector<32xf32> to vector<32x1xf32>
    %28 = vector.broadcast %27 : vector<32x1xf32> to vector<32x8xf32>
    %29 = arith.subf %25, %28 : vector<32x8xf32>
    %30 = math.exp %29 : vector<32x8xf32>
    %cst_16 = arith.constant dense<0.000000e+00> : vector<32xf32>
    %31 = vector.multi_reduction <add>, %30, %cst_16 [1] : vector<32x8xf32> to vector<32xf32>
    %32 = vector.shape_cast %31 : vector<32xf32> to vector<32x1xf32>
    %33 = vector.broadcast %32 : vector<32x1xf32> to vector<32x8xf32>
    %34 = arith.divf %30, %33 : vector<32x8xf32>
    %cst_17 = arith.constant dense<0.000000e+00> : vector<32x32xf32>
    %35 = tpu.matmul %34, %21, %cst_17 {dimension_numbers = #tpu.dot_dimension_numbers<[1], [0], [0], [1], [0, 0, 1, 1], [], []>} : vector<32x8xf32>, vector<8x32xf32>, vector<32x32xf32> -> vector<32x32xf32>
    %36 = arith.mulf %35, %0 : vector<32x32xf32>
    %37 = vector.extract_strided_slice %36 {offsets = [0, 0], sizes = [8, 32], strides = [1, 1]} : vector<32x32xf32> to vector<8x32xf32>
    %38 = vector.extract_strided_slice %36 {offsets = [8, 0], sizes = [8, 32], strides = [1, 1]} : vector<32x32xf32> to vector<8x32xf32>
    %39 = arith.addf %37, %38 : vector<8x32xf32>
    %40 = vector.extract_strided_slice %36 {offsets = [16, 0], sizes = [8, 32], strides = [1, 1]} : vector<32x32xf32> to vector<8x32xf32>
    %41 = arith.addf %39, %40 : vector<8x32xf32>
    %42 = vector.extract_strided_slice %36 {offsets = [24, 0], sizes = [8, 32], strides = [1, 1]} : vector<32x32xf32> to vector<8x32xf32>
    %43 = arith.addf %41, %42 : vector<8x32xf32>
    %44 = vector.extract_strided_slice %15 {offsets = [8, 0], sizes = [8, 32], strides = [1, 1]} : vector<16x32xf32> to vector<8x32xf32>
    %45 = vector.extract_strided_slice %16 {offsets = [8, 0], sizes = [8, 32], strides = [1, 1]} : vector<16x32xf32> to vector<8x32xf32>
    %46 = vector.extract_strided_slice %17 {offsets = [8, 0], sizes = [8, 32], strides = [1, 1]} : vector<16x32xf32> to vector<8x32xf32>
    %47 = tpu.concatenate %44, %44, %44, %44 in 0 : vector<8x32xf32>, vector<8x32xf32>, vector<8x32xf32>, vector<8x32xf32> -> vector<32x32xf32>
    %48 = arith.mulf %47, %0 : vector<32x32xf32>
    %cst_18 = arith.constant dense<0.000000e+00> : vector<32x8xf32>
    %49 = tpu.matmul %48, %45, %cst_18 {dimension_numbers = #tpu.dot_dimension_numbers<[1], [1], [0], [0], [0, 0, 1, 0], [], []>} : vector<32x32xf32>, vector<8x32xf32>, vector<32x8xf32> -> vector<32x8xf32>
    %50 = arith.addf %49, %18 : vector<32x8xf32>
    %cst_19 = arith.constant dense<0xFF800000> : vector<32xf32>
    %51 = vector.multi_reduction <maximumf>, %50, %cst_19 [1] : vector<32x8xf32> to vector<32xf32>
    %52 = vector.shape_cast %51 : vector<32xf32> to vector<32x1xf32>
    %53 = vector.broadcast %52 : vector<32x1xf32> to vector<32x8xf32>
    %54 = arith.subf %50, %53 : vector<32x8xf32>
    %55 = math.exp %54 : vector<32x8xf32>
    %cst_20 = arith.constant dense<0.000000e+00> : vector<32xf32>
    %56 = vector.multi_reduction <add>, %55, %cst_20 [1] : vector<32x8xf32> to vector<32xf32>
    %57 = vector.shape_cast %56 : vector<32xf32> to vector<32x1xf32>
    %58 = vector.broadcast %57 : vector<32x1xf32> to vector<32x8xf32>
    %59 = arith.divf %55, %58 : vector<32x8xf32>
    %cst_21 = arith.constant dense<0.000000e+00> : vector<32x32xf32>
    %60 = tpu.matmul %59, %46, %cst_21 {dimension_numbers = #tpu.dot_dimension_numbers<[1], [0], [0], [1], [0, 0, 1, 1], [], []>} : vector<32x8xf32>, vector<8x32xf32>, vector<32x32xf32> -> vector<32x32xf32>
    %61 = arith.mulf %60, %0 : vector<32x32xf32>
    %62 = vector.extract_strided_slice %61 {offsets = [0, 0], sizes = [8, 32], strides = [1, 1]} : vector<32x32xf32> to vector<8x32xf32>
    %63 = vector.extract_strided_slice %61 {offsets = [8, 0], sizes = [8, 32], strides = [1, 1]} : vector<32x32xf32> to vector<8x32xf32>
    %64 = arith.addf %62, %63 : vector<8x32xf32>
    %65 = vector.extract_strided_slice %61 {offsets = [16, 0], sizes = [8, 32], strides = [1, 1]} : vector<32x32xf32> to vector<8x32xf32>
    %66 = arith.addf %64, %65 : vector<8x32xf32>
    %67 = vector.extract_strided_slice %61 {offsets = [24, 0], sizes = [8, 32], strides = [1, 1]} : vector<32x32xf32> to vector<8x32xf32>
    %68 = arith.addf %66, %67 : vector<8x32xf32>
    %69 = tpu.concatenate %43, %68 in 0 : vector<8x32xf32>, vector<8x32xf32> -> vector<16x32xf32>
    %c0_22 = arith.constant 0 : index
    %c0_23 = arith.constant 0 : index
    %70 = vector.load %arg6[%c0_22, %c0_23] : memref<32x32xf32, #tpu.memory_space<vmem>>, vector<32x32xf32>
    %cst_24 = arith.constant dense<0.000000e+00> : vector<16x32xf32>
    %71 = tpu.matmul %69, %70, %cst_24 {dimension_numbers = #tpu.dot_dimension_numbers<[1], [0], [0], [1], [0, 0, 1, 1], [], []>} : vector<16x32xf32>, vector<32x32xf32>, vector<16x32xf32> -> vector<16x32xf32>
    %c0_25 = arith.constant 0 : index
    %c0_26 = arith.constant 0 : index
    %72 = vector.load %arg7[%c0_25, %c0_26] : memref<1x32xf32, #tpu.memory_space<vmem>>, vector<1x32xf32>
    %73 = vector.broadcast %72 : vector<1x32xf32> to vector<16x32xf32>
    %74 = arith.addf %71, %73 : vector<16x32xf32>
    %75 = arith.addf %7, %74 : vector<16x32xf32>
    %c0_27 = arith.constant 0 : index
    %c0_28 = arith.constant 0 : index
    %76 = vector.load %arg8[%c0_27, %c0_28] : memref<1x32xf32, #tpu.memory_space<vmem>>, vector<1x32xf32>
    %c0_29 = arith.constant 0 : index
    %c0_30 = arith.constant 0 : index
    %77 = vector.load %arg9[%c0_29, %c0_30] : memref<1x32xf32, #tpu.memory_space<vmem>>, vector<1x32xf32>
    %cst_31 = arith.constant dense<0.000000e+00> : vector<16xf32>
    %78 = vector.multi_reduction <add>, %75, %cst_31 [1] : vector<16x32xf32> to vector<16xf32>
    %79 = vector.shape_cast %78 : vector<16xf32> to vector<16x1xf32>
    %cst_32 = arith.constant 3.200000e+01 : f32
    %80 = vector.broadcast %cst_32 : f32 to vector<16x1xf32>
    %81 = arith.divf %79, %80 : vector<16x1xf32>
    %82 = vector.broadcast %81 : vector<16x1xf32> to vector<16x32xf32>
    %83 = arith.subf %75, %82 : vector<16x32xf32>
    %84 = arith.mulf %83, %83 : vector<16x32xf32>
    %cst_33 = arith.constant dense<0.000000e+00> : vector<16xf32>
    %85 = vector.multi_reduction <add>, %84, %cst_33 [1] : vector<16x32xf32> to vector<16xf32>
    %86 = vector.shape_cast %85 : vector<16xf32> to vector<16x1xf32>
    %cst_34 = arith.constant 3.200000e+01 : f32
    %87 = vector.broadcast %cst_34 : f32 to vector<16x1xf32>
    %88 = arith.divf %86, %87 : vector<16x1xf32>
    %89 = vector.broadcast %81 : vector<16x1xf32> to vector<16x32xf32>
    %90 = arith.subf %75, %89 : vector<16x32xf32>
    %cst_35 = arith.constant 9.99999997E-7 : f32
    %91 = vector.broadcast %cst_35 : f32 to vector<16x1xf32>
    %92 = arith.addf %88, %91 : vector<16x1xf32>
    %93 = math.rsqrt %92 : vector<16x1xf32>
    %94 = vector.broadcast %93 : vector<16x1xf32> to vector<16x32xf32>
    %95 = arith.mulf %90, %94 : vector<16x32xf32>
    %96 = vector.broadcast %76 : vector<1x32xf32> to vector<16x32xf32>
    %97 = arith.mulf %95, %96 : vector<16x32xf32>
    %98 = vector.broadcast %77 : vector<1x32xf32> to vector<16x32xf32>
    %99 = arith.addf %97, %98 : vector<16x32xf32>
    %c0_36 = arith.constant 0 : index
    %c0_37 = arith.constant 0 : index
    %100 = vector.load %arg10[%c0_36, %c0_37] : memref<32x32xf32, #tpu.memory_space<vmem>>, vector<32x32xf32>
    %cst_38 = arith.constant dense<0.000000e+00> : vector<16x32xf32>
    %101 = tpu.matmul %99, %100, %cst_38 {dimension_numbers = #tpu.dot_dimension_numbers<[1], [0], [0], [1], [0, 0, 1, 1], [], []>} : vector<16x32xf32>, vector<32x32xf32>, vector<16x32xf32> -> vector<16x32xf32>
    %c0_39 = arith.constant 0 : index
    %c0_40 = arith.constant 0 : index
    %102 = vector.load %arg11[%c0_39, %c0_40] : memref<1x32xf32, #tpu.memory_space<vmem>>, vector<1x32xf32>
    %103 = vector.broadcast %102 : vector<1x32xf32> to vector<16x32xf32>
    %104 = arith.addf %101, %103 : vector<16x32xf32>
    %cst_41 = arith.constant 0.353553385 : f32
    %105 = vector.broadcast %cst_41 : f32 to vector<16x32xf32>
    %106 = arith.mulf %104, %105 : vector<16x32xf32>
    %107 = vector.extract_strided_slice %2 {offsets = [0, 0, 0], sizes = [10, 1, 32], strides = [1, 1, 1]} : vector<10x2x32xf32> to vector<10x1x32xf32>
    %108 = vector.shape_cast %107 : vector<10x1x32xf32> to vector<10x32xf32>
    %c0_42 = arith.constant 0 : index
    %c0_43 = arith.constant 0 : index
    %109 = vector.load %arg12[%c0_42, %c0_43] : memref<32x64xf32, #tpu.memory_space<vmem>>, vector<32x64xf32>
    %cst_44 = arith.constant dense<0.000000e+00> : vector<10x64xf32>
    %110 = tpu.matmul %108, %109, %cst_44 {dimension_numbers = #tpu.dot_dimension_numbers<[1], [0], [0], [1], [0, 0, 1, 1], [], []>} : vector<10x32xf32>, vector<32x64xf32>, vector<10x64xf32> -> vector<10x64xf32>
    %c0_45 = arith.constant 0 : index
    %c0_46 = arith.constant 0 : index
    %111 = vector.load %arg13[%c0_45, %c0_46] : memref<1x64xf32, #tpu.memory_space<vmem>>, vector<1x64xf32>
    %112 = vector.broadcast %111 : vector<1x64xf32> to vector<10x64xf32>
    %113 = arith.addf %110, %112 : vector<10x64xf32>
    %114 = vector.extract_strided_slice %106 {offsets = [0, 0], sizes = [8, 32], strides = [1, 1]} : vector<16x32xf32> to vector<8x32xf32>
    %115 = vector.extract_strided_slice %113 {offsets = [0, 0], sizes = [10, 32], strides = [1, 1]} : vector<10x64xf32> to vector<10x32xf32>
    %116 = vector.extract_strided_slice %113 {offsets = [0, 32], sizes = [10, 32], strides = [1, 1]} : vector<10x64xf32> to vector<10x32xf32>
    %117 = tpu.concatenate %114, %114, %114, %114 in 0 : vector<8x32xf32>, vector<8x32xf32>, vector<8x32xf32>, vector<8x32xf32> -> vector<32x32xf32>
    %118 = arith.mulf %117, %0 : vector<32x32xf32>
    %cst_47 = arith.constant dense<0.000000e+00> : vector<32x10xf32>
    %119 = tpu.matmul %118, %115, %cst_47 {dimension_numbers = #tpu.dot_dimension_numbers<[1], [1], [0], [0], [0, 0, 1, 0], [], []>} : vector<32x32xf32>, vector<10x32xf32>, vector<32x10xf32> -> vector<32x10xf32>
    %cst_48 = arith.constant dense<0xFF800000> : vector<32xf32>
    %120 = vector.multi_reduction <maximumf>, %119, %cst_48 [1] : vector<32x10xf32> to vector<32xf32>
    %121 = vector.shape_cast %120 : vector<32xf32> to vector<32x1xf32>
    %122 = vector.broadcast %121 : vector<32x1xf32> to vector<32x10xf32>
    %123 = arith.subf %119, %122 : vector<32x10xf32>
    %124 = math.exp %123 : vector<32x10xf32>
    %cst_49 = arith.constant dense<0.000000e+00> : vector<32xf32>
    %125 = vector.multi_reduction <add>, %124, %cst_49 [1] : vector<32x10xf32> to vector<32xf32>
    %126 = vector.shape_cast %125 : vector<32xf32> to vector<32x1xf32>
    %127 = vector.broadcast %126 : vector<32x1xf32> to vector<32x10xf32>
    %128 = arith.divf %124, %127 : vector<32x10xf32>
    %cst_50 = arith.constant dense<0.000000e+00> : vector<32x32xf32>
    %129 = tpu.matmul %128, %116, %cst_50 {dimension_numbers = #tpu.dot_dimension_numbers<[1], [0], [0], [1], [0, 0, 1, 1], [], []>} : vector<32x10xf32>, vector<10x32xf32>, vector<32x32xf32> -> vector<32x32xf32>
    %130 = arith.mulf %129, %0 : vector<32x32xf32>
    %131 = vector.extract_strided_slice %130 {offsets = [0, 0], sizes = [8, 32], strides = [1, 1]} : vector<32x32xf32> to vector<8x32xf32>
    %132 = vector.extract_strided_slice %128 {offsets = [0, 0], sizes = [8, 10], strides = [1, 1]} : vector<32x10xf32> to vector<8x10xf32>
    %133 = vector.extract_strided_slice %130 {offsets = [8, 0], sizes = [8, 32], strides = [1, 1]} : vector<32x32xf32> to vector<8x32xf32>
    %134 = arith.addf %131, %133 : vector<8x32xf32>
    %135 = vector.extract_strided_slice %128 {offsets = [8, 0], sizes = [8, 10], strides = [1, 1]} : vector<32x10xf32> to vector<8x10xf32>
    %136 = arith.addf %132, %135 : vector<8x10xf32>
    %137 = vector.extract_strided_slice %130 {offsets = [16, 0], sizes = [8, 32], strides = [1, 1]} : vector<32x32xf32> to vector<8x32xf32>
    %138 = arith.addf %134, %137 : vector<8x32xf32>
    %139 = vector.extract_strided_slice %128 {offsets = [16, 0], sizes = [8, 10], strides = [1, 1]} : vector<32x10xf32> to vector<8x10xf32>
    %140 = arith.addf %136, %139 : vector<8x10xf32>
    %141 = vector.extract_strided_slice %130 {offsets = [24, 0], sizes = [8, 32], strides = [1, 1]} : vector<32x32xf32> to vector<8x32xf32>
    %142 = arith.addf %138, %141 : vector<8x32xf32>
    %143 = vector.extract_strided_slice %128 {offsets = [24, 0], sizes = [8, 10], strides = [1, 1]} : vector<32x10xf32> to vector<8x10xf32>
    %144 = arith.addf %140, %143 : vector<8x10xf32>
    %cst_51 = arith.constant 2.500000e-01 : f32
    %145 = vector.broadcast %cst_51 : f32 to vector<8x10xf32>
    %146 = arith.mulf %144, %145 : vector<8x10xf32>
    %147 = vector.extract_strided_slice %2 {offsets = [0, 1, 0], sizes = [10, 1, 32], strides = [1, 1, 1]} : vector<10x2x32xf32> to vector<10x1x32xf32>
    %148 = vector.shape_cast %147 : vector<10x1x32xf32> to vector<10x32xf32>
    %c0_52 = arith.constant 0 : index
    %c0_53 = arith.constant 0 : index
    %149 = vector.load %arg12[%c0_52, %c0_53] : memref<32x64xf32, #tpu.memory_space<vmem>>, vector<32x64xf32>
    %cst_54 = arith.constant dense<0.000000e+00> : vector<10x64xf32>
    %150 = tpu.matmul %148, %149, %cst_54 {dimension_numbers = #tpu.dot_dimension_numbers<[1], [0], [0], [1], [0, 0, 1, 1], [], []>} : vector<10x32xf32>, vector<32x64xf32>, vector<10x64xf32> -> vector<10x64xf32>
    %c0_55 = arith.constant 0 : index
    %c0_56 = arith.constant 0 : index
    %151 = vector.load %arg13[%c0_55, %c0_56] : memref<1x64xf32, #tpu.memory_space<vmem>>, vector<1x64xf32>
    %152 = vector.broadcast %151 : vector<1x64xf32> to vector<10x64xf32>
    %153 = arith.addf %150, %152 : vector<10x64xf32>
    %154 = vector.extract_strided_slice %106 {offsets = [8, 0], sizes = [8, 32], strides = [1, 1]} : vector<16x32xf32> to vector<8x32xf32>
    %155 = vector.extract_strided_slice %153 {offsets = [0, 0], sizes = [10, 32], strides = [1, 1]} : vector<10x64xf32> to vector<10x32xf32>
    %156 = vector.extract_strided_slice %153 {offsets = [0, 32], sizes = [10, 32], strides = [1, 1]} : vector<10x64xf32> to vector<10x32xf32>
    %157 = tpu.concatenate %154, %154, %154, %154 in 0 : vector<8x32xf32>, vector<8x32xf32>, vector<8x32xf32>, vector<8x32xf32> -> vector<32x32xf32>
    %158 = arith.mulf %157, %0 : vector<32x32xf32>
    %cst_57 = arith.constant dense<0.000000e+00> : vector<32x10xf32>
    %159 = tpu.matmul %158, %155, %cst_57 {dimension_numbers = #tpu.dot_dimension_numbers<[1], [1], [0], [0], [0, 0, 1, 0], [], []>} : vector<32x32xf32>, vector<10x32xf32>, vector<32x10xf32> -> vector<32x10xf32>
    %cst_58 = arith.constant dense<0xFF800000> : vector<32xf32>
    %160 = vector.multi_reduction <maximumf>, %159, %cst_58 [1] : vector<32x10xf32> to vector<32xf32>
    %161 = vector.shape_cast %160 : vector<32xf32> to vector<32x1xf32>
    %162 = vector.broadcast %161 : vector<32x1xf32> to vector<32x10xf32>
    %163 = arith.subf %159, %162 : vector<32x10xf32>
    %164 = math.exp %163 : vector<32x10xf32>
    %cst_59 = arith.constant dense<0.000000e+00> : vector<32xf32>
    %165 = vector.multi_reduction <add>, %164, %cst_59 [1] : vector<32x10xf32> to vector<32xf32>
    %166 = vector.shape_cast %165 : vector<32xf32> to vector<32x1xf32>
    %167 = vector.broadcast %166 : vector<32x1xf32> to vector<32x10xf32>
    %168 = arith.divf %164, %167 : vector<32x10xf32>
    %cst_60 = arith.constant dense<0.000000e+00> : vector<32x32xf32>
    %169 = tpu.matmul %168, %156, %cst_60 {dimension_numbers = #tpu.dot_dimension_numbers<[1], [0], [0], [1], [0, 0, 1, 1], [], []>} : vector<32x10xf32>, vector<10x32xf32>, vector<32x32xf32> -> vector<32x32xf32>
    %170 = arith.mulf %169, %0 : vector<32x32xf32>
    %171 = vector.extract_strided_slice %170 {offsets = [0, 0], sizes = [8, 32], strides = [1, 1]} : vector<32x32xf32> to vector<8x32xf32>
    %172 = vector.extract_strided_slice %168 {offsets = [0, 0], sizes = [8, 10], strides = [1, 1]} : vector<32x10xf32> to vector<8x10xf32>
    %173 = vector.extract_strided_slice %170 {offsets = [8, 0], sizes = [8, 32], strides = [1, 1]} : vector<32x32xf32> to vector<8x32xf32>
    %174 = arith.addf %171, %173 : vector<8x32xf32>
    %175 = vector.extract_strided_slice %168 {offsets = [8, 0], sizes = [8, 10], strides = [1, 1]} : vector<32x10xf32> to vector<8x10xf32>
    %176 = arith.addf %172, %175 : vector<8x10xf32>
    %177 = vector.extract_strided_slice %170 {offsets = [16, 0], sizes = [8, 32], strides = [1, 1]} : vector<32x32xf32> to vector<8x32xf32>
    %178 = arith.addf %174, %177 : vector<8x32xf32>
    %179 = vector.extract_strided_slice %168 {offsets = [16, 0], sizes = [8, 10], strides = [1, 1]} : vector<32x10xf32> to vector<8x10xf32>
    %180 = arith.addf %176, %179 : vector<8x10xf32>
    %181 = vector.extract_strided_slice %170 {offsets = [24, 0], sizes = [8, 32], strides = [1, 1]} : vector<32x32xf32> to vector<8x32xf32>
    %182 = arith.addf %178, %181 : vector<8x32xf32>
    %183 = vector.extract_strided_slice %168 {offsets = [24, 0], sizes = [8, 10], strides = [1, 1]} : vector<32x10xf32> to vector<8x10xf32>
    %184 = arith.addf %180, %183 : vector<8x10xf32>
    %cst_61 = arith.constant 2.500000e-01 : f32
    %185 = vector.broadcast %cst_61 : f32 to vector<8x10xf32>
    %186 = arith.mulf %184, %185 : vector<8x10xf32>
    %187 = tpu.concatenate %142, %182 in 0 : vector<8x32xf32>, vector<8x32xf32> -> vector<16x32xf32>
    %c0_62 = arith.constant 0 : index
    %c0_63 = arith.constant 0 : index
    %188 = vector.load %arg14[%c0_62, %c0_63] : memref<32x32xf32, #tpu.memory_space<vmem>>, vector<32x32xf32>
    %cst_64 = arith.constant dense<0.000000e+00> : vector<16x32xf32>
    %189 = tpu.matmul %187, %188, %cst_64 {dimension_numbers = #tpu.dot_dimension_numbers<[1], [0], [0], [1], [0, 0, 1, 1], [], []>} : vector<16x32xf32>, vector<32x32xf32>, vector<16x32xf32> -> vector<16x32xf32>
    %c0_65 = arith.constant 0 : index
    %c0_66 = arith.constant 0 : index
    %190 = vector.load %arg15[%c0_65, %c0_66] : memref<1x32xf32, #tpu.memory_space<vmem>>, vector<1x32xf32>
    %191 = vector.broadcast %190 : vector<1x32xf32> to vector<16x32xf32>
    %192 = arith.addf %189, %191 : vector<16x32xf32>
    %193 = arith.addf %192, %99 : vector<16x32xf32>
    %c0_67 = arith.constant 0 : index
    %c0_68 = arith.constant 0 : index
    %194 = vector.load %arg16[%c0_67, %c0_68] : memref<1x32xf32, #tpu.memory_space<vmem>>, vector<1x32xf32>
    %c0_69 = arith.constant 0 : index
    %c0_70 = arith.constant 0 : index
    %195 = vector.load %arg17[%c0_69, %c0_70] : memref<1x32xf32, #tpu.memory_space<vmem>>, vector<1x32xf32>
    %cst_71 = arith.constant dense<0.000000e+00> : vector<16xf32>
    %196 = vector.multi_reduction <add>, %193, %cst_71 [1] : vector<16x32xf32> to vector<16xf32>
    %197 = vector.shape_cast %196 : vector<16xf32> to vector<16x1xf32>
    %cst_72 = arith.constant 3.200000e+01 : f32
    %198 = vector.broadcast %cst_72 : f32 to vector<16x1xf32>
    %199 = arith.divf %197, %198 : vector<16x1xf32>
    %200 = vector.broadcast %199 : vector<16x1xf32> to vector<16x32xf32>
    %201 = arith.subf %193, %200 : vector<16x32xf32>
    %202 = arith.mulf %201, %201 : vector<16x32xf32>
    %cst_73 = arith.constant dense<0.000000e+00> : vector<16xf32>
    %203 = vector.multi_reduction <add>, %202, %cst_73 [1] : vector<16x32xf32> to vector<16xf32>
    %204 = vector.shape_cast %203 : vector<16xf32> to vector<16x1xf32>
    %cst_74 = arith.constant 3.200000e+01 : f32
    %205 = vector.broadcast %cst_74 : f32 to vector<16x1xf32>
    %206 = arith.divf %204, %205 : vector<16x1xf32>
    %207 = vector.broadcast %199 : vector<16x1xf32> to vector<16x32xf32>
    %208 = arith.subf %193, %207 : vector<16x32xf32>
    %cst_75 = arith.constant 9.99999997E-7 : f32
    %209 = vector.broadcast %cst_75 : f32 to vector<16x1xf32>
    %210 = arith.addf %206, %209 : vector<16x1xf32>
    %211 = math.rsqrt %210 : vector<16x1xf32>
    %212 = vector.broadcast %211 : vector<16x1xf32> to vector<16x32xf32>
    %213 = arith.mulf %208, %212 : vector<16x32xf32>
    %214 = vector.broadcast %194 : vector<1x32xf32> to vector<16x32xf32>
    %215 = arith.mulf %213, %214 : vector<16x32xf32>
    %216 = vector.broadcast %195 : vector<1x32xf32> to vector<16x32xf32>
    %217 = arith.addf %215, %216 : vector<16x32xf32>
    %c0_76 = arith.constant 0 : index
    %c0_77 = arith.constant 0 : index
    %218 = vector.load %arg18[%c0_76, %c0_77] : memref<32x64xf32, #tpu.memory_space<vmem>>, vector<32x64xf32>
    %cst_78 = arith.constant dense<0.000000e+00> : vector<16x64xf32>
    %219 = tpu.matmul %217, %218, %cst_78 {dimension_numbers = #tpu.dot_dimension_numbers<[1], [0], [0], [1], [0, 0, 1, 1], [], []>} : vector<16x32xf32>, vector<32x64xf32>, vector<16x64xf32> -> vector<16x64xf32>
    %c0_79 = arith.constant 0 : index
    %c0_80 = arith.constant 0 : index
    %220 = vector.load %arg19[%c0_79, %c0_80] : memref<1x64xf32, #tpu.memory_space<vmem>>, vector<1x64xf32>
    %221 = vector.broadcast %220 : vector<1x64xf32> to vector<16x64xf32>
    %222 = arith.addf %219, %221 : vector<16x64xf32>
    %cst_81 = arith.constant 5.000000e-01 : f32
    %223 = vector.broadcast %cst_81 : f32 to vector<16x64xf32>
    %224 = arith.mulf %223, %222 : vector<16x64xf32>
    %cst_82 = arith.constant 0.707106769 : f32
    %225 = vector.broadcast %cst_82 : f32 to vector<16x64xf32>
    %226 = arith.mulf %222, %225 : vector<16x64xf32>
    %cst_83 = arith.constant 0.000000e+00 : f32
    %227 = vector.broadcast %cst_83 : f32 to vector<16x64xf32>
    %228 = arith.cmpf oge, %226, %227 : vector<16x64xf32>
    %cst_84 = arith.constant 1.000000e+00 : f32
    %cst_85 = arith.constant -1.000000e+00 : f32
    %229 = vector.broadcast %cst_84 : f32 to vector<16x64xf32>
    %230 = vector.broadcast %cst_85 : f32 to vector<16x64xf32>
    %231 = arith.select %228, %229, %230 : vector<16x64xi1>, vector<16x64xf32>
    %232 = math.absf %226 : vector<16x64xf32>
    %cst_86 = arith.constant 0.327591091 : f32
    %233 = vector.broadcast %cst_86 : f32 to vector<16x64xf32>
    %234 = arith.mulf %233, %232 : vector<16x64xf32>
    %cst_87 = arith.constant 1.000000e+00 : f32
    %235 = vector.broadcast %cst_87 : f32 to vector<16x64xf32>
    %236 = arith.addf %235, %234 : vector<16x64xf32>
    %cst_88 = arith.constant 1.000000e+00 : f32
    %237 = vector.broadcast %cst_88 : f32 to vector<16x64xf32>
    %238 = arith.divf %237, %236 : vector<16x64xf32>
    %cst_89 = arith.constant 1.06140542 : f32
    %239 = vector.broadcast %cst_89 : f32 to vector<16x64xf32>
    %240 = arith.mulf %239, %238 : vector<16x64xf32>
    %cst_90 = arith.constant -1.45315206 : f32
    %241 = vector.broadcast %cst_90 : f32 to vector<16x64xf32>
    %242 = arith.addf %240, %241 : vector<16x64xf32>
    %243 = arith.mulf %242, %238 : vector<16x64xf32>
    %cst_91 = arith.constant 1.42141378 : f32
    %244 = vector.broadcast %cst_91 : f32 to vector<16x64xf32>
    %245 = arith.addf %243, %244 : vector<16x64xf32>
    %246 = arith.mulf %245, %238 : vector<16x64xf32>
    %cst_92 = arith.constant -0.284496725 : f32
    %247 = vector.broadcast %cst_92 : f32 to vector<16x64xf32>
    %248 = arith.addf %246, %247 : vector<16x64xf32>
    %249 = arith.mulf %248, %238 : vector<16x64xf32>
    %cst_93 = arith.constant 0.254829586 : f32
    %250 = vector.broadcast %cst_93 : f32 to vector<16x64xf32>
    %251 = arith.addf %249, %250 : vector<16x64xf32>
    %252 = arith.mulf %251, %238 : vector<16x64xf32>
    %cst_94 = arith.constant 0.000000e+00 : f32
    %253 = vector.broadcast %cst_94 : f32 to vector<16x64xf32>
    %254 = arith.subf %253, %232 : vector<16x64xf32>
    %255 = arith.mulf %254, %232 : vector<16x64xf32>
    %256 = math.exp %255 : vector<16x64xf32>
    %257 = arith.mulf %252, %256 : vector<16x64xf32>
    %cst_95 = arith.constant 1.000000e+00 : f32
    %258 = vector.broadcast %cst_95 : f32 to vector<16x64xf32>
    %259 = arith.subf %258, %257 : vector<16x64xf32>
    %260 = arith.mulf %231, %259 : vector<16x64xf32>
    %cst_96 = arith.constant 1.000000e+00 : f32
    %261 = vector.broadcast %cst_96 : f32 to vector<16x64xf32>
    %262 = arith.addf %261, %260 : vector<16x64xf32>
    %263 = arith.mulf %224, %262 : vector<16x64xf32>
    %c0_97 = arith.constant 0 : index
    %c0_98 = arith.constant 0 : index
    %264 = vector.load %arg20[%c0_97, %c0_98] : memref<64x32xf32, #tpu.memory_space<vmem>>, vector<64x32xf32>
    %cst_99 = arith.constant dense<0.000000e+00> : vector<16x32xf32>
    %265 = tpu.matmul %263, %264, %cst_99 {dimension_numbers = #tpu.dot_dimension_numbers<[1], [0], [0], [1], [0, 0, 1, 1], [], []>} : vector<16x64xf32>, vector<64x32xf32>, vector<16x32xf32> -> vector<16x32xf32>
    %c0_100 = arith.constant 0 : index
    %c0_101 = arith.constant 0 : index
    %266 = vector.load %arg21[%c0_100, %c0_101] : memref<1x32xf32, #tpu.memory_space<vmem>>, vector<1x32xf32>
    %267 = vector.broadcast %266 : vector<1x32xf32> to vector<16x32xf32>
    %268 = arith.addf %265, %267 : vector<16x32xf32>
    %269 = arith.addf %217, %268 : vector<16x32xf32>
    %c0_102 = arith.constant 0 : index
    %c0_103 = arith.constant 0 : index
    %270 = vector.load %arg22[%c0_102, %c0_103] : memref<1x32xf32, #tpu.memory_space<vmem>>, vector<1x32xf32>
    %c0_104 = arith.constant 0 : index
    %c0_105 = arith.constant 0 : index
    %271 = vector.load %arg23[%c0_104, %c0_105] : memref<1x32xf32, #tpu.memory_space<vmem>>, vector<1x32xf32>
    %cst_106 = arith.constant dense<0.000000e+00> : vector<16xf32>
    %272 = vector.multi_reduction <add>, %269, %cst_106 [1] : vector<16x32xf32> to vector<16xf32>
    %273 = vector.shape_cast %272 : vector<16xf32> to vector<16x1xf32>
    %cst_107 = arith.constant 3.200000e+01 : f32
    %274 = vector.broadcast %cst_107 : f32 to vector<16x1xf32>
    %275 = arith.divf %273, %274 : vector<16x1xf32>
    %276 = vector.broadcast %275 : vector<16x1xf32> to vector<16x32xf32>
    %277 = arith.subf %269, %276 : vector<16x32xf32>
    %278 = arith.mulf %277, %277 : vector<16x32xf32>
    %cst_108 = arith.constant dense<0.000000e+00> : vector<16xf32>
    %279 = vector.multi_reduction <add>, %278, %cst_108 [1] : vector<16x32xf32> to vector<16xf32>
    %280 = vector.shape_cast %279 : vector<16xf32> to vector<16x1xf32>
    %cst_109 = arith.constant 3.200000e+01 : f32
    %281 = vector.broadcast %cst_109 : f32 to vector<16x1xf32>
    %282 = arith.divf %280, %281 : vector<16x1xf32>
    %283 = vector.broadcast %275 : vector<16x1xf32> to vector<16x32xf32>
    %284 = arith.subf %269, %283 : vector<16x32xf32>
    %cst_110 = arith.constant 9.99999997E-7 : f32
    %285 = vector.broadcast %cst_110 : f32 to vector<16x1xf32>
    %286 = arith.addf %282, %285 : vector<16x1xf32>
    %287 = math.rsqrt %286 : vector<16x1xf32>
    %288 = vector.broadcast %287 : vector<16x1xf32> to vector<16x32xf32>
    %289 = arith.mulf %284, %288 : vector<16x32xf32>
    %290 = vector.broadcast %270 : vector<1x32xf32> to vector<16x32xf32>
    %291 = arith.mulf %289, %290 : vector<16x32xf32>
    %292 = vector.broadcast %271 : vector<1x32xf32> to vector<16x32xf32>
    %293 = arith.addf %291, %292 : vector<16x32xf32>
    %294 = vector.shape_cast %146 : vector<8x10xf32> to vector<1x8x10xf32>
    %295 = vector.shape_cast %186 : vector<8x10xf32> to vector<1x8x10xf32>
    %296 = tpu.concatenate %294, %295 in 0 : vector<1x8x10xf32>, vector<1x8x10xf32> -> vector<2x8x10xf32>
    %c0_111 = arith.constant 0 : index
    %c0_112 = arith.constant 0 : index
    %c0_113 = arith.constant 0 : index
    %297 = vector.load %arg26[%c0_111, %c0_112, %c0_113] : memref<2x8x10xf32, #tpu.memory_space<vmem>>, vector<2x8x10xf32>
    tpu.vector_store %arg26[%c0_111, %c0_112, %c0_113], %296 {strides = array<i32>} : memref<2x8x10xf32, #tpu.memory_space<vmem>>, vector<2x8x10xf32>,
    %298 = tpu.iota {dimensions = array<i32: 0>} : vector<8x8xi32>
    %299 = tpu.iota {dimensions = array<i32: 1>} : vector<8x8xi32>
    %300 = arith.cmpi sle, %299, %298 : vector<8x8xi32>
    %301 = arith.extui %300 : vector<8x8xi1> to vector<8x8xi32>
    %302 = arith.sitofp %301 : vector<8x8xi32> to vector<8x8xf32>
    %cst_114 = arith.constant dense<0.000000e+00> : vector<8x10xf32>
    %303 = tpu.matmul %302, %146, %cst_114 {dimension_numbers = #tpu.dot_dimension_numbers<[1], [0], [0], [1], [0, 0, 1, 1], [], []>} : vector<8x8xf32>, vector<8x10xf32>, vector<8x10xf32> -> vector<8x10xf32>
    %304 = arith.cmpf olt, %146, %303 : vector<8x10xf32>
    %305 = arith.select %304, %146, %303 : vector<8x10xi1>, vector<8x10xf32>
    %306 = vector.shape_cast %305 : vector<8x10xf32> to vector<1x8x10xf32>
    %cst_115 = arith.constant dense<0.000000e+00> : vector<1xf32>
    %307 = vector.multi_reduction <add>, %306, %cst_115 [1, 2] : vector<1x8x10xf32> to vector<1xf32>
    %308 = vector.shape_cast %307 : vector<1xf32> to vector<1x1x1xf32>
    %309 = vector.extract %308[0, 0, 0] : f32 from vector<1x1x1xf32>
    %cst_116 = arith.constant 0.000000e+00 : f32
    %310 = arith.addf %cst_116, %309 : f32
    %cst_117 = arith.constant dense<0xFF800000> : vector<10xf32>
    %311 = vector.multi_reduction <maximumf>, %146, %cst_117 [0] : vector<8x10xf32> to vector<10xf32>
    %312 = vector.shape_cast %311 : vector<10xf32> to vector<1x10xf32>
    %313 = vector.shape_cast %312 : vector<1x10xf32> to vector<1x1x10xf32>
    %cst_118 = arith.constant dense<0.000000e+00> : vector<1xf32>
    %314 = vector.multi_reduction <add>, %313, %cst_118 [1, 2] : vector<1x1x10xf32> to vector<1xf32>
    %315 = vector.shape_cast %314 : vector<1xf32> to vector<1x1x1xf32>
    %316 = vector.extract %315[0, 0, 0] : f32 from vector<1x1x1xf32>
    %cst_119 = arith.constant 0.000000e+00 : f32
    %317 = arith.addf %cst_119, %316 : f32
    %cst_120 = arith.constant dense<0.000000e+00> : vector<8x10xf32>
    %318 = tpu.matmul %302, %186, %cst_120 {dimension_numbers = #tpu.dot_dimension_numbers<[1], [0], [0], [1], [0, 0, 1, 1], [], []>} : vector<8x8xf32>, vector<8x10xf32>, vector<8x10xf32> -> vector<8x10xf32>
    %319 = arith.cmpf olt, %186, %318 : vector<8x10xf32>
    %320 = arith.select %319, %186, %318 : vector<8x10xi1>, vector<8x10xf32>
    %321 = vector.shape_cast %320 : vector<8x10xf32> to vector<1x8x10xf32>
    %cst_121 = arith.constant dense<0.000000e+00> : vector<1xf32>
    %322 = vector.multi_reduction <add>, %321, %cst_121 [1, 2] : vector<1x8x10xf32> to vector<1xf32>
    %323 = vector.shape_cast %322 : vector<1xf32> to vector<1x1x1xf32>
    %324 = vector.extract %323[0, 0, 0] : f32 from vector<1x1x1xf32>
    %325 = arith.addf %310, %324 : f32
    %cst_122 = arith.constant dense<0xFF800000> : vector<10xf32>
    %326 = vector.multi_reduction <maximumf>, %186, %cst_122 [0] : vector<8x10xf32> to vector<10xf32>
    %327 = vector.shape_cast %326 : vector<10xf32> to vector<1x10xf32>
    %328 = vector.shape_cast %327 : vector<1x10xf32> to vector<1x1x10xf32>
    %cst_123 = arith.constant dense<0.000000e+00> : vector<1xf32>
    %329 = vector.multi_reduction <add>, %328, %cst_123 [1, 2] : vector<1x1x10xf32> to vector<1xf32>
    %330 = vector.shape_cast %329 : vector<1xf32> to vector<1x1x1xf32>
    %331 = vector.extract %330[0, 0, 0] : f32 from vector<1x1x1xf32>
    %332 = arith.addf %317, %331 : f32
    %cst_124 = arith.constant 1.600000e+01 : f32
    %333 = arith.divf %325, %cst_124 : f32
    %cst_125 = arith.constant 2.000000e+01 : f32
    %334 = arith.divf %332, %cst_125 : f32
    %335 = arith.subf %333, %334 : f32
    %cst_126 = arith.constant 1.000000e+00 : f32
    %336 = vector.broadcast %cst_126 : f32 to vector<1x1xf32>
    %337 = vector.broadcast %335 : f32 to vector<1x1xf32>
    %338 = arith.mulf %337, %336 : vector<1x1xf32>
    %c0_127 = arith.constant 0 : index
    %c0_128 = arith.constant 0 : index
    %339 = vector.load %arg27[%c0_127, %c0_128] : memref<1x1xf32, #tpu.memory_space<vmem>>, vector<1x1xf32>
    tpu.vector_store %arg27[%c0_127, %c0_128], %338 {strides = array<i32>} : memref<1x1xf32, #tpu.memory_space<vmem>>, vector<1x1xf32>,
    %cst_129 = arith.constant dense<0.000000e+00> : vector<2x10xf32>
    %340 = vector.multi_reduction <add>, %296, %cst_129 [1] : vector<2x8x10xf32> to vector<2x10xf32>
    %cst_130 = arith.constant 1.000000e+00 : f32
    %341 = vector.broadcast %cst_130 : f32 to vector<2x10xf32>
    %342 = arith.minimumf %340, %341 : vector<2x10xf32>
    %343 = math.log %342 : vector<2x10xf32>
    %cst_131 = arith.constant dense<0.000000e+00> : vector<2xf32>
    %344 = vector.multi_reduction <add>, %343, %cst_131 [1] : vector<2x10xf32> to vector<2xf32>
    %345 = vector.shape_cast %344 : vector<2xf32> to vector<2x1xf32>
    %c0_132 = arith.constant 0 : index
    %c0_133 = arith.constant 0 : index
    %346 = vector.load %arg28[%c0_132, %c0_133] : memref<2x1xf32, #tpu.memory_space<vmem>>, vector<2x1xf32>
    tpu.vector_store %arg28[%c0_132, %c0_133], %345 {strides = array<i32>} : memref<2x1xf32, #tpu.memory_space<vmem>>, vector<2x1xf32>,
    %347 = vector.extract_strided_slice %293 {offsets = [0, 0], sizes = [8, 32], strides = [1, 1]} : vector<16x32xf32> to vector<8x32xf32>
    %348 = vector.shape_cast %347 : vector<8x32xf32> to vector<1x8x32xf32>
    %349 = vector.extract_strided_slice %293 {offsets = [8, 0], sizes = [8, 32], strides = [1, 1]} : vector<16x32xf32> to vector<8x32xf32>
    %350 = vector.shape_cast %349 : vector<8x32xf32> to vector<1x8x32xf32>
    %351 = tpu.concatenate %348, %350 in 0 : vector<1x8x32xf32>, vector<1x8x32xf32> -> vector<2x8x32xf32>
    %c0_134 = arith.constant 0 : index
    %c0_135 = arith.constant 0 : index
    %c0_136 = arith.constant 0 : index
    %352 = vector.load %arg24[%c0_134, %c0_135, %c0_136] : memref<2x8x32xf32, #tpu.memory_space<vmem>>, vector<2x8x32xf32>
    tpu.vector_store %arg24[%c0_134, %c0_135, %c0_136], %351 {strides = array<i32>} : memref<2x8x32xf32, #tpu.memory_space<vmem>>, vector<2x8x32xf32>,
    %353 = vector.extract_strided_slice %193 {offsets = [0, 0], sizes = [8, 32], strides = [1, 1]} : vector<16x32xf32> to vector<8x32xf32>
    %354 = vector.shape_cast %353 : vector<8x32xf32> to vector<1x8x32xf32>
    %355 = vector.extract_strided_slice %193 {offsets = [8, 0], sizes = [8, 32], strides = [1, 1]} : vector<16x32xf32> to vector<8x32xf32>
    %356 = vector.shape_cast %355 : vector<8x32xf32> to vector<1x8x32xf32>
    %357 = tpu.concatenate %354, %356 in 0 : vector<1x8x32xf32>, vector<1x8x32xf32> -> vector<2x8x32xf32>
    %c0_137 = arith.constant 0 : index
    %c0_138 = arith.constant 0 : index
    %c0_139 = arith.constant 0 : index
    %358 = vector.load %arg25[%c0_137, %c0_138, %c0_139] : memref<2x8x32xf32, #tpu.memory_space<vmem>>, vector<2x8x32xf32>
    tpu.vector_store %arg25[%c0_137, %c0_138, %c0_139], %357 {strides = array<i32>} : memref<2x8x32xf32, #tpu.memory_space<vmem>>, vector<2x8x32xf32>,
    return
  }
}

</mosaic_0001>

<bundles_post_ra>
// kernel: eq.8
= control target key start
LH: loop header
LB: loop body
LE: loop exit
PB: predicated region body
PF: predicated region fallthrough
CT: control target
= control target key end

     0   :  { %vm8_vm0 = vcmask 64512   ;;  %s40_s8 = smov 8   ;;  %s41_s9 = smov 16   ;;  %vm14_vm1 = vcmask 261312   ;;  %vm20_vm2 = vcmask 195712   ;;  %vm26_vm3 = vcmask 130112   ;;  %s58_s0 = inlined_call_operand.vmem [shape: s32[4,8], index: 0, kind: input, shape index: {}]   ;;  %s59_s1 = inlined_call_operand.vmem [shape: s32[32], index: 1, kind: output, shape index: {}]  }
   0x1   :  { %v5_v0 = vld [vmem:[%s58_s0] sm:$0xf]  ;;  %s39_s0 = smov 24  }
   0x2   :  { %6 = vst [vmem:[#allocation1] sm:$0xf] %v5_v0 }
   0x9   :  { %v11_v1 = vld [vmem:[#allocation1 + $0x3] sm:$0x1]   ;;  %v23_v2 = vld [vmem:[#allocation1 + $0x1] sm:$0x1]   ;;  %v7_v3 = vld [vmem:[#allocation1] sm:$0x1]  }
   0xa   :  { %12 = vrot.lane.b32.xlu0 %v11_v1, %s39_s0  ;;  %24 = vrot.lane.b32.xlu1 %v23_v2, %s40_s8  ;;  %v17_v4 = vld [vmem:[#allocation1 + $0x2] sm:$0x1]   ;;  %9 = vst.msk [vmem:[#allocation0] sm:$0x1] %vm8_vm0, %v7_v3  }
   0xe   :  { %18 = vrot.lane.b32.xlu0 %v17_v4, %s41_s9 }
  0x7c   :  { %v13_v5 = vpop.permute.xlu0 %12   ;;  %v25_v6 = vpop.permute.xlu1 %24  }
  0x7d   :  { %15 = vst.msk [vmem:[#allocation0] sm:$0x1] %vm14_vm1, %v13_v5  }
  0x80   :  { %v19_v7 = vpop.permute.xlu0 %18  }
  0x81   :  { %21 = vst.msk [vmem:[#allocation0] sm:$0x1] %vm20_vm2, %v19_v7  }
  0x82   :  { %27 = vst.msk [vmem:[#allocation0] sm:$0x1] %vm26_vm3, %v25_v6  }
  0x89   :  { %v32_v8 = vld [vmem:[#allocation0] sm:$0x1] }
  0x8a   :  { %35 = vst [vmem:[%s59_s1] sm:$0x1] %v32_v8 }

// kernel: copycat_decoder_layer_forward.1
= control target key start
LH: loop header
LB: loop body
LE: loop exit
PB: predicated region body
PF: predicated region fallthrough
CT: control target
= control target key end

     0   :  { %s3745_s0 = inlined_call_operand.vmem [shape: f32[8,2,32], index: 0, kind: input, shape index: {}]   ;;  %s3746_s1 = inlined_call_operand.vmem [shape: f32[10,2,32], index: 1, kind: input, shape index: {}]   ;;  %s3747_s2 = inlined_call_operand.vmem [shape: f32[32,8], index: 2, kind: input, shape index: {}]   ;;  %s3748_s3 = inlined_call_operand.vmem [shape: f32[32,32], index: 3, kind: input, shape index: {}]   ;;  %s3749_s4 = inlined_call_operand.vmem [shape: f32[32,96], index: 4, kind: input, shape index: {}]   ;;  %s3750_s5 = inlined_call_operand.vmem [shape: f32[1,96], index: 5, kind: input, shape index: {}]   ;;  %s3751_s6 = inlined_call_operand.vmem [shape: f32[32,32], index: 6, kind: input, shape index: {}]   ;;  %s3752_s7 = inlined_call_operand.vmem [shape: f32[1,32], index: 7, kind: input, shape index: {}]   ;;  %s3753_s8 = inlined_call_operand.vmem [shape: f32[1,32], index: 8, kind: input, shape index: {}]   ;;  %s3754_s9 = inlined_call_operand.vmem [shape: f32[1,32], index: 9, kind: input, shape index: {}]   ;;  %s3755_s10 = inlined_call_operand.vmem [shape: f32[32,32], index: 10, kind: input, shape index: {}]   ;;  %s3756_s11 = inlined_call_operand.vmem [shape: f32[1,32], index: 11, kind: input, shape index: {}]   ;;  %s3757_s12 = inlined_call_operand.vmem [shape: f32[32,64], index: 12, kind: input, shape index: {}]   ;;  %s3758_s13 = inlined_call_operand.vmem [shape: f32[1,64], index: 13, kind: input, shape index: {}]   ;;  %s3759_s14 = inlined_call_operand.vmem [shape: f32[32,32], index: 14, kind: input, shape index: {}]   ;;  %s3760_s15 = inlined_call_operand.vmem [shape: f32[1,32], index: 15, kind: input, shape index: {}]   ;;  %s3761_s16 = inlined_call_operand.vmem [shape: f32[1,32], index: 16, kind: input, shape index: {}]   ;;  %s3762_s17 = inlined_call_operand.vmem [shape: f32[1,32], index: 17, kind: input, shape index: {}]   ;;  %s3763_s18 = inlined_call_operand.vmem [shape: f32[32,64], index: 18, kind: input, shape index: {}]   ;;  %s3764_s19 = inlined_call_operand.vmem [shape: f32[1,64], index: 19, kind: input, shape index: {}]   ;;  %s3765_s20 = inlined_call_operand.vmem [shape: f32[64,32], index: 20, kind: input, shape index: {}]   ;;  %s3766_s21 = inlined_call_operand.vmem [shape: f32[1,32], index: 21, kind: input, shape index: {}]   ;;  %s3767_s22 = inlined_call_operand.vmem [shape: f32[1,32], index: 22, kind: input, shape index: {}]   ;;  %s3768_s23 = inlined_call_operand.vmem [shape: f32[1,32], index: 23, kind: input, shape index: {}]   ;;  %s3769_s24 = inlined_call_operand.vmem [shape: f32[2,8,32], index: 24, kind: output, shape index: {0}]   ;;  %s3770_s25 = inlined_call_operand.vmem [shape: f32[2,8,32], index: 25, kind: output, shape index: {1}]   ;;  %s3771_s26 = inlined_call_operand.hbm [shape: f32[2,8,10], index: 26, kind: output, shape index: {2}]   ;;  %s3772_s27 = inlined_call_operand.hbm [shape: f32[1,1], index: 27, kind: output, shape index: {3}]   ;;  %s3773_s28 = inlined_call_operand.vmem [shape: f32[2,1], index: 28, kind: output, shape index: {4}]  }
   0x1   :  { %3782 = sst [smem:[#allocation8_spill]] %s3745_s0 }
   0x2   :  { %3783 = sst [smem:[#allocation9_spill]] %s3746_s1 }
   0x3   :  { %3784 = sst [smem:[#allocation10_spill]] %s3747_s2 }
   0x4   :  { %3785 = sst [smem:[#allocation11_spill]] %s3748_s3 }
   0x5   :  { %3786 = sst [smem:[#allocation12_spill]] %s3749_s4 }
   0x6   :  { %3787 = sst [smem:[#allocation13_spill]] %s3750_s5 }
   0x7   :  { %3788 = sst [smem:[#allocation14_spill]] %s3751_s6 }
   0x8   :  { %3789 = sst [smem:[#allocation15_spill]] %s3752_s7 }
   0x9   :  { %3790 = sst [smem:[#allocation16_spill]] %s3753_s8 }
   0xa   :  { %3791 = sst [smem:[#allocation17_spill]] %s3754_s9 }
   0xb   :  { %3792 = sst [smem:[#allocation18_spill]] %s3755_s10 }
   0xc   :  { %3793 = sst [smem:[#allocation19_spill]] %s3756_s11 }
   0xd   :  { %3794 = sst [smem:[#allocation20_spill]] %s3757_s12 }
   0xe   :  { %34 = vsyncpa [#allocation3], 0  ;;  %s3795_s9 = sld [smem:[#allocation12_spill]]  ;;  %vm115_vm0 = vcmask 1041409   ;;  %vm118_vm1 = vcmask 1042434  }
   0xf   :  { %s3796_s29 = sld [smem:[#allocation8_spill]] }
  0x14   :  { %v154_v0 = vld [vmem:[%s3795_s9 + $0x18] sm:$0xff]  ;;  %v153_v1 = vld [vmem:[%s3795_s9 + $0x10] sm:$0xff]  ;;  %v152_v2 = vld [vmem:[%s3795_s9 + $0x8] sm:$0xff] }
  0x15   :  { %2641 = vmatprep.subr.mxu0 %v154_v0  ;;  %v89_v3 = vld [vmem:[%s3796_s29 + $0x2] sm:$0x3]  ;;  %v90_v4 = vld [vmem:[%s3796_s29 + $0x4] sm:$0x3]  ;;  %v91_v5 = vld [vmem:[%s3796_s29 + $0x6] sm:$0x3] }
  0x16   :  { %2642 = vmatpush3.msra.mxu0 %v154_v0  ;;  %v92_v6 = vld [vmem:[%s3796_s29 + $0x8] sm:$0x3]  ;;  %v88_v7 = vld [vmem:[%s3796_s29] sm:$0x3]  ;;  %v93_v8 = vld [vmem:[%s3796_s29 + $0xa] sm:$0x3] }
  0x17   :  { %2643 = vmatprep.subr.mxu0 %v153_v1  ;;  %v94_v9 = vld [vmem:[%s3796_s29 + $0xc] sm:$0x3]  ;;  %v151_v10 = vld [vmem:[%s3795_s9] sm:$0xff]  ;;  %v114_v11 = vrot.slane %v89_v3, 7  ;;  %v117_v12 = vrot.slane %v90_v4, 6  ;;  %v120_v13 = vrot.slane %v91_v5, 5 }
  0x18   :  { %2644 = vmatpush3.msra.mxu0 %v153_v1 }
  0x19   :  { %35 = vsyncpa [#allocation5], 0  ;;  %2645 = vmatprep.subr.mxu0 %v152_v2  ;;  %v95_v14 = vld [vmem:[%s3796_s29 + $0xe] sm:$0x3]  ;;  %vm121_vm2 = vcmask 1043459   ;;  %v123_v15 = vrot.slane %v92_v6, 4  ;;  %v116_v16 = vsel %vm115_vm0, %v114_v11, %v88_v7 }
  0x1a   :  { %vm124_vm3 = vcmask 1044484   ;;  %2646 = vmatpush3.msra.mxu0 %v152_v2  ;;  %v126_v17 = vrot.slane %v93_v8, 3  ;;  %vm127_vm4 = vcmask 1045509   ;;  %v136_v18 = vrot.slane %v88_v7, 1  ;;  %s3797_s1 = sld [smem:[#allocation13_spill]]  ;;  %s2974_s4 = smov 96  }
  0x1b   :  { %2647 = vmatprep.subr.mxu0 %v151_v10  ;;  %v119_v19 = vsel %vm118_vm1, %v117_v12, %v116_v16  ;;  %v129_v20 = vrot.slane %v94_v9, 2  ;;  %v138_v21 = vrot.slane %v90_v4, 7  ;;  %v140_v22 = vrot.slane %v91_v5, 6  ;;  %s3798_s30 = sld [smem:[#allocation11_spill]]  ;;  %s2975_s3 = smov 64  }
  0x1c   :  { %2648 = vmatpush3.msra.mxu0 %v151_v10  ;;  %v122_v23 = vsel %vm121_vm2, %v120_v13, %v119_v19  ;;  %vm130_vm5 = vcmask 1046534   ;;  %v132_v24 = vrot.slane %v95_v14, 1  ;;  %v142_v25 = vrot.slane %v92_v6, 5  ;;  %s3799_s9 = sld [smem:[#allocation10_spill]] }
  0x1d   :  { %v125_v26 = vsel %vm124_vm3, %v123_v15, %v122_v23  ;;  %vm133_vm6 = vcmask 1047559   ;;  %v144_v27 = vrot.slane %v93_v8, 4  ;;  %v137_v28 = vsel %vm115_vm0, %v89_v3, %v136_v18  ;;  %s3800_s2 = sld [smem:[#allocation14_spill]] }
  0x1e   :  { %v128_v29 = vsel %vm127_vm4, %v126_v17, %v125_v26  ;;  %v146_v30 = vrot.slane %v94_v9, 3  ;;  %vm162_vm7 = vcmask 261120   ;;  %v139_v31 = vsel %vm118_vm1, %v138_v21, %v137_v28  ;;  %s3801_s6 = sld [smem:[#allocation15_spill]] }
  0x1f   :  { %v131_v32 = vsel %vm130_vm5, %v129_v20, %v128_v29  ;;  %v148_v33 = vrot.slane %v95_v14, 2  ;;  %v141_v34 = vsel %vm121_vm2, %v140_v22, %v139_v31  ;;  %vm354_vm8 = vcmask 64512   ;;  %s3802_s11 = sld [smem:[#allocation20_spill]] }
  0x20   :  { %v3174_v35 = vsel %vm133_vm6, %v132_v24, %v131_v32  ;;  %v143_v36 = vsel %vm124_vm3, %v142_v25, %v141_v34  ;;  %v2469_v40 = vld [vmem:[%s3797_s1] ss:$0 sm:$0xff]  ;;  %s3803_s8 = sld [smem:[#allocation18_spill]]  ;;  %vm1219_vm9 = vcmask 80896   ;;  %vm1281_vm10 = vcmask 1041408  }
  0x21   :  { %2649 = vmatprep.mubr.msk.f32.mxu0 %vm162_vm7, %v3174_v35  ;;  %v145_v37 = vsel %vm127_vm4, %v144_v27, %v143_v36  ;;  %v3195_v46 = vld [vmem:[%s3798_s30] sm:$0xff]  ;;  %v3204_v49 = vld [vmem:[%s3798_s30 + $0x8] sm:$0xff]  ;;  %v3210_v51 = vld [vmem:[%s3798_s30 + $0x10] sm:$0xff]  ;;  %s3807_s0 = sld [smem:[#allocation19_spill]]  ;;  %vm2977_vm12 = vmmov 0   ;;  %vm2040_vm15 = vcmask 523264  }
  0x22   :  { %v147_v38 = vsel %vm130_vm5, %v146_v30, %v145_v37  ;;  %v3218_v53 = vld [vmem:[%s3798_s30 + $0x18] sm:$0xff]  ;;  %v3230_v59 = vld [vmem:[%s3799_s9 + $0x10] sm:$0xff]  ;;  %v3236_v61 = vld [vmem:[%s3799_s9 + $0x8] sm:$0xff] }
  0x23   :  { %v3182_v39 = vsel %vm133_vm6, %v148_v33, %v147_v38  ;;  %v3225_v57 = vld [vmem:[%s3799_s9 + $0x18] sm:$0xff]  ;;  %v244_v15 = vld [vmem:[%s3799_s9] sm:$0xff] }
  0x24   :  { %2650 = vmatmul.mubr.msk.f32.vlgmr.msra.gmra.mxu0 %vm162_vm7, %v3182_v39 }
  0xe4   :  { %v2651_v41 = vpop.f32.mrf.mxu0 }
  0xe5   :  { %v3189_v42 = vadd.f32 %v2651_v41, %v2469_v40 }
  0xe6   :  { %v233_v43 = vpop.f32.mrf.mxu0 }
  0xe7   :  { %v234_v44 = vadd.f32 %v2469_v40, %v233_v43  ;;  %v243_v22 = vmul.f32 0.35355338, %v3189_v42 }
  0xe9   :  { %v242_v45 = vmul.f32 0.35355338, %v234_v44  ;;  %253 = vrot.lane.b32.xlu0 %v234_v44, %s2974_s4  ;;  %v506_v26 = vmul.f32 %v243_v22, %v3195_v46  ;;  %v507_v27 = vmul.f32 %v243_v22, %v3204_v49  ;;  %v508_v28 = vmul.f32 %v243_v22, %v3210_v51 }
  0xea   :  { %v509_v29 = vmul.f32 %v243_v22, %v3218_v53 }
  0xeb   :  { %v248_v47 = vmul.f32 %v242_v45, %v3195_v46  ;;  %v249_v50 = vmul.f32 %v242_v45, %v3204_v49  ;;  %v250_v52 = vmul.f32 %v242_v45, %v3210_v51  ;;  %v251_v54 = vmul.f32 %v242_v45, %v3218_v53 }
  0xed   :  { %2654 = vmatprep.mubr.msk.f32.mxu1 %vm162_vm7, %v248_v47 }
 0x15b   :  { %v254_v48 = vpop.permute.xlu0 %253 }
 0x15c   :  { %2652 = vmatprep.subr.msk.mxu1 %vm162_vm7, %v254_v48 }
 0x15d   :  { %2653 = vmatpush3.xpose.msk.msra.mxu1 %vm162_vm7, %v254_v48 }
 0x160   :  { %2655 = vmatmul.mubr.msk.f32.vlgmr.msra.gmra.mxu1 %vm162_vm7, %v249_v50 }
 0x161   :  { %2657 = vmatprep.mubr.msk.f32.mxu1 %vm162_vm7, %v250_v52 }
 0x164   :  { %2658 = vmatmul.mubr.msk.f32.gmra.mxu1 %vm162_vm7, %v251_v54 }
 0x220   :  { %v2656_v55 = vpop.f32.mrf.mxu1 }
 0x221   :  { %v3241_v1 = vadd.f32 %v2656_v55, %v3236_v61 }
 0x222   :  { %v335_v56 = vpop.f32.mrf.mxu1 }
 0x223   :  { %v358_v3 = vsel %vm354_vm8, %v3241_v1, -inf  ;;  %v336_v16 = vadd.f32 %v335_v56, %v244_v15 }
 0x224   :  { %v2659_v58 = vpop.f32.mrf.mxu1 }
 0x225   :  { %v351_v60 = vadd.f32 %v2659_v58, %v3225_v57  ;;  %v355_v17 = vsel %vm354_vm8, %v336_v16, -inf }
 0x226   :  { %v345_v62 = vpop.f32.mrf.mxu1 }
 0x227   :  { %v346_v63 = vadd.f32 %v345_v62, %v3230_v59  ;;  %v364_v0 = vsel %vm354_vm8, %v351_v60, -inf }
 0x228   :  { %365 = vmax.xlane.f32.xlu1 %v364_v0 }
 0x229   :  { %v361_v2 = vsel %vm354_vm8, %v346_v63, -inf }
 0x22a   :  { %362 = vmax.xlane.f32.xlu0 %v361_v2 }
 0x22e   :  { %359 = vmax.xlane.f32.xlu0 %v358_v3 }
 0x239   :  { %399 = vrot.lane.b32.xlu1 %v234_v44, %s2975_s3 }
 0x2b1   :  { %v366_v4 = vpop.xlane.xlu1 %365 }
 0x2b2   :  { %v370_v5 = vsub.f32 %v351_v60, %v366_v4 }
 0x2b3   :  { %v363_v6 = vpop.xlane.xlu0 %362 }
 0x2b4   :  { %v377_v7 = vmul.f32 1.442695, %v370_v5  ;;  %v369_v8 = vsub.f32 %v346_v63, %v363_v6 }
 0x2b5   :  { %v400_v9 = vpop.permute.xlu1 %399 }
 0x2b6   :  { %2838 = vpow2.f32 %v377_v7  ;;  %v375_v10 = vmul.f32 1.442695, %v369_v8  ;;  %2660 = vmatprep.subr.mxu0 %v400_v9  ;;  %2819 = vmatprep.subr.mxu1 %v400_v9 }
 0x2b7   :  { %2661 = vmatpush3.msra.mxu0 %v400_v9  ;;  %2820 = vmatpush3.msra.mxu1 %v400_v9  ;;  %v360_v32 = vpop.xlane.xlu0 %359 }
 0x2b8   :  { %2840 = vpow2.f32 %v375_v10  ;;  %v368_v36 = vsub.f32 %v3241_v1, %v360_v32 }
 0x2ba   :  { %v373_v43 = vmul.f32 1.442695, %v368_v36 }
 0x2c3   :  { %v2839_v11 = vpop.eup %2838 }
 0x2c4   :  { %v388_v12 = vsel %vm354_vm8, %v2839_v11, 0.0 }
 0x2c5   :  { %v2841_v13 = vpop.eup %2840  ;;  %389 = vadd.xlane.f32.xlu1 %v388_v12 }
 0x2c6   :  { %v385_v14 = vsel %vm354_vm8, %v2841_v13, 0.0 }
 0x2c9   :  { %386 = vadd.xlane.f32.xlu1 %v385_v14 }
 0x2da   :  { %511 = vrot.lane.b32.xlu1 %v3189_v42, %s2974_s4 }
 0x2fe   :  { %356 = vmax.xlane.f32.xlu1 %v355_v17 }
 0x34e   :  { %v390_v18 = vpop.xlane.xlu1 %389 }
 0x34f   :  { %2842 = vrcp.f32 %v390_v18 }
 0x352   :  { %v387_v19 = vpop.xlane.xlu1 %386 }
 0x353   :  { %2844 = vrcp.f32 %v387_v19 }
 0x356   :  { %v512_v20 = vpop.permute.xlu1 %511 }
 0x357   :  { %2668 = vmatprep.subr.msk.mxu1 %vm162_vm7, %v512_v20 }
 0x35c   :  { %v2843_v21 = vpop.eup %2842 }
 0x35d   :  { %v398_v25 = vmul.f32 %v2843_v21, %v2839_v11 }
 0x360   :  { %v2845_v23 = vpop.eup %2844 }
 0x361   :  { %v396_v24 = vmul.f32 %v2845_v23, %v2841_v13 }
 0x363   :  { %2665 = vmatprep.mubr.msk.f32.mxu1 %vm354_vm8, %v396_v24 }
 0x364   :  { %2666 = vmatmul.mubr.msk.f32.vlgmr.msra.gmra.mxu1 %vm354_vm8, %v398_v25 }
 0x365   :  { %2669 = vmatpush3.xpose.msk.msra.mxu1 %vm162_vm7, %v512_v20  ;;  %2670 = vmatprep.mubr.msk.f32.mxu1 %vm162_vm7, %v506_v26 }
 0x368   :  { %2671 = vmatmul.mubr.msk.f32.vlgmr.msra.gmra.mxu1 %vm162_vm7, %v507_v27 }
 0x369   :  { %2673 = vmatprep.mubr.msk.f32.mxu1 %vm162_vm7, %v508_v28 }
 0x36c   :  { %2674 = vmatmul.mubr.msk.f32.gmra.mxu1 %vm162_vm7, %v509_v29 }
 0x387   :  { %v357_v30 = vpop.xlane.xlu1 %356 }
 0x388   :  { %v367_v31 = vsub.f32 %v336_v16, %v357_v30 }
 0x38a   :  { %v371_v37 = vmul.f32 1.442695, %v367_v31 }
 0x38c   :  { %2846 = vpow2.f32 %v371_v37 }
 0x38d   :  { %2848 = vpow2.f32 %v373_v43 }
 0x399   :  { %v2847_v58 = vpop.eup %2846 }
 0x39a   :  { %v379_v60 = vsel %vm354_vm8, %v2847_v58, 0.0 }
 0x424   :  { %v3268_v33 = vpop.f32.mrf.mxu1 }
 0x426   :  { %v3270_v34 = vpop.f32.mrf.mxu1 }
 0x428   :  { %v2672_v38 = vpop.f32.mrf.mxu1 }
 0x429   :  { %v599_v40 = vadd.f32 %v2672_v38, %v3236_v61  ;;  %v2849_v61 = vpop.eup %2848 }
 0x42a   :  { %v593_v41 = vpop.f32.mrf.mxu1  ;;  %v382_v62 = vsel %vm354_vm8, %v2849_v61, 0.0 }
 0x42b   :  { %v594_v44 = vadd.f32 %v593_v41, %v244_v15  ;;  %v615_v45 = vsel %vm354_vm8, %v599_v40, -inf }
 0x42c   :  { %616 = vmax.xlane.f32.xlu0 %v615_v45  ;;  %v2675_v47 = vpop.f32.mrf.mxu1 }
 0x42d   :  { %v612_v52 = vsel %vm354_vm8, %v594_v44, -inf  ;;  %v609_v54 = vadd.f32 %v2675_v47, %v3225_v57  ;;  %v502_v47 = vmul.f32 %v3268_v33, %v3218_v53  ;;  %v764_v33 = vld [vmem:[%s3800_s2 + $0x8] sm:$0xff] }
 0x42e   :  { %v603_v48 = vpop.f32.mrf.mxu1 }
 0x42f   :  { %v604_v50 = vadd.f32 %v603_v48, %v3230_v59  ;;  %v621_v56 = vsel %vm354_vm8, %v609_v54, -inf }
 0x430   :  { %613 = vmax.xlane.f32.xlu0 %v612_v52  ;;  %v766_v52 = vld [vmem:[%s3800_s2 + $0x18] sm:$0xff] }
 0x431   :  { %v618_v55 = vsel %vm354_vm8, %v604_v50, -inf  ;;  %2684 = vmatprep.subr.mxu1 %v766_v52 }
 0x432   :  { %2685 = vmatpush3.msra.mxu1 %v766_v52 }
 0x434   :  { %619 = vmax.xlane.f32.xlu0 %v618_v55 }
 0x438   :  { %622 = vmax.xlane.f32.xlu0 %v621_v56 }
 0x43c   :  { %380 = vadd.xlane.f32.xlu0 %v379_v60 }
 0x440   :  { %383 = vadd.xlane.f32.xlu0 %v382_v62 }
 0x4b5   :  { %v617_v59 = vpop.xlane.xlu0 %616 }
 0x4b6   :  { %v625_v63 = vsub.f32 %v599_v40, %v617_v59 }
 0x4b8   :  { %v630_v2 = vmul.f32 1.442695, %v625_v63 }
 0x4b9   :  { %v614_v0 = vpop.xlane.xlu0 %613 }
 0x4ba   :  { %v624_v1 = vsub.f32 %v594_v44, %v614_v0  ;;  %v501_v44 = vmul.f32 %v3270_v34, %v3210_v51  ;;  %v763_v34 = vld [vmem:[%s3800_s2] sm:$0xff] }
 0x4bc   :  { %v628_v57 = vmul.f32 1.442695, %v624_v1 }
 0x4bd   :  { %v620_v3 = vpop.xlane.xlu0 %619 }
 0x4be   :  { %2850 = vpow2.f32 %v628_v57  ;;  %v626_v4 = vsub.f32 %v604_v50, %v620_v3  ;;  %v2490_v3 = vld [vmem:[%s3801_s6] ss:$0 sm:$0xff]  ;;  %s3804_s6 = sld [smem:[#allocation9_spill]] }
 0x4bf   :  { %2852 = vpow2.f32 %v630_v2 }
 0x4c0   :  { %v632_v5 = vmul.f32 1.442695, %v626_v4 }
 0x4c1   :  { %v623_v6 = vpop.xlane.xlu0 %622 }
 0x4c2   :  { %2854 = vpow2.f32 %v632_v5  ;;  %v627_v7 = vsub.f32 %v609_v54, %v623_v6  ;;  %v765_v54 = vld [vmem:[%s3800_s2 + $0x10] sm:$0xff] }
 0x4c3   :  { %2686 = vmatprep.subr.mxu1 %v765_v54 }
 0x4c4   :  { %v634_v8 = vmul.f32 1.442695, %v627_v7  ;;  %2687 = vmatpush3.msra.mxu1 %v765_v54  ;;  %v3432_v54 = vld [vmem:[%s3804_s6 + $0x10] sm:$0x3] }
 0x4c5   :  { %v381_v9 = vpop.xlane.xlu0 %380  ;;  %2688 = vmatprep.subr.mxu1 %v764_v33 }
 0x4c6   :  { %2856 = vpow2.f32 %v634_v8  ;;  %2689 = vmatpush3.msra.mxu1 %v764_v33 }
 0x4c7   :  { %2858 = vrcp.f32 %v381_v9  ;;  %2690 = vmatprep.subr.mxu1 %v763_v34 }
 0x4c8   :  { %2691 = vmatpush3.msra.mxu1 %v763_v34 }
 0x4c9   :  { %v384_v10 = vpop.xlane.xlu0 %383 }
 0x4ca   :  { %2860 = vrcp.f32 %v384_v10 }
 0x4cb   :  { %v2851_v11 = vpop.eup %2850 }
 0x4cc   :  { %v636_v12 = vsel %vm354_vm8, %v2851_v11, 0.0  ;;  %v2853_v13 = vpop.eup %2852 }
 0x4cd   :  { %637 = vadd.xlane.f32.xlu0 %v636_v12  ;;  %v639_v16 = vsel %vm354_vm8, %v2853_v13, 0.0 }
 0x4cf   :  { %v2855_v14 = vpop.eup %2854 }
 0x4d0   :  { %v642_v15 = vsel %vm354_vm8, %v2855_v14, 0.0 }
 0x4d1   :  { %643 = vadd.xlane.f32.xlu1 %v642_v15  ;;  %640 = vadd.xlane.f32.xlu0 %v639_v16 }
 0x4d3   :  { %v2857_v17 = vpop.eup %2856 }
 0x4d4   :  { %v2859_v18 = vpop.eup %2858  ;;  %v645_v19 = vsel %vm354_vm8, %v2857_v17, 0.0 }
 0x4d5   :  { %646 = vadd.xlane.f32.xlu0 %v645_v19  ;;  %v392_v20 = vmul.f32 %v2859_v18, %v2847_v58  ;;  %v3338_v19 = vld [vmem:[%s3802_s11 + $0x18] sm:$0xff] }
 0x4d6   :  { %2706 = vmatprep.subr.mxu1 %v3338_v19 }
 0x4d7   :  { %v2861_v21 = vpop.eup %2860  ;;  %2662 = vmatprep.mubr.msk.f32.mxu0 %vm354_vm8, %v392_v20  ;;  %v3343_v20 = vld [vmem:[%s3802_s11 + $0x10] sm:$0xff] }
 0x4d8   :  { %v394_v22 = vmul.f32 %v2861_v21, %v2849_v61  ;;  %v3349_v21 = vld [vmem:[%s3802_s11 + $0x8] sm:$0xff] }
 0x4da   :  { %2663 = vmatmul.mubr.msk.f32.vlgmr.msra.gmra.mxu0 %vm354_vm8, %v394_v22  ;;  %v905_v22 = vld [vmem:[%s3803_s8 + $0x18] sm:$0xff] }
 0x4e2   :  { %656 = vrot.lane.b32.xlu1 %v3189_v42, %s2975_s3 }
 0x556   :  { %v638_v23 = vpop.xlane.xlu0 %637 }
 0x557   :  { %2862 = vrcp.f32 %v638_v23  ;;  %v3358_v23 = vld [vmem:[%s3804_s6 + $0x2] sm:$0x3] }
 0x55a   :  { %v641_v24 = vpop.xlane.xlu0 %640  ;;  %v644_v25 = vpop.xlane.xlu1 %643 }
 0x55b   :  { %2864 = vrcp.f32 %v641_v24  ;;  %v3363_v24 = vld [vmem:[%s3804_s6 + $0x4] sm:$0x3] }
 0x55c   :  { %2866 = vrcp.f32 %v644_v25  ;;  %v3368_v25 = vld [vmem:[%s3804_s6 + $0x6] sm:$0x3] }
 0x55e   :  { %v647_v26 = vpop.xlane.xlu0 %646  ;;  %v657_v27 = vpop.permute.xlu1 %656 }
 0x55f   :  { %2868 = vrcp.f32 %v647_v26  ;;  %2676 = vmatprep.subr.mxu0 %v657_v27  ;;  %v3374_v26 = vld [vmem:[%s3804_s6] sm:$0x3] }
 0x560   :  { %2677 = vmatpush3.msra.mxu0 %v657_v27  ;;  %v3379_v27 = vld [vmem:[%s3804_s6 + $0x8] sm:$0x3] }
 0x561   :  { %2695 = vmatprep.subr.mxu0 %v905_v22 }
 0x564   :  { %v2863_v28 = vpop.eup %2862 }
 0x565   :  { %v649_v29 = vmul.f32 %v2863_v28, %v2851_v11  ;;  %v3384_v28 = vld [vmem:[%s3804_s6 + $0xa] sm:$0x3] }
 0x567   :  { %2678 = vmatprep.mubr.msk.f32.mxu0 %vm354_vm8, %v649_v29  ;;  %v3390_v29 = vld [vmem:[%s3802_s11] sm:$0xff]  ;;  %s3805_s11 = sld [smem:[#allocation16_spill]] }
 0x568   :  { %v2865_v30 = vpop.eup %2864 }
 0x569   :  { %v2867_v31 = vpop.eup %2866  ;;  %v651_v32 = vmul.f32 %v2865_v30, %v2853_v13  ;;  %v3395_v30 = vld [vmem:[%s3804_s6 + $0xc] sm:$0x3] }
 0x56a   :  { %v653_v36 = vmul.f32 %v2867_v31, %v2855_v14  ;;  %v1017_v31 = vrot.slane %v3358_v23, 7 }
 0x56b   :  { %2679 = vmatmul.mubr.msk.f32.vlgmr.msra.gmra.mxu0 %vm354_vm8, %v651_v32  ;;  %v1019_v32 = vrot.slane %v3363_v24, 6 }
 0x56c   :  { %v2869_v42 = vpop.eup %2868  ;;  %2681 = vmatprep.mubr.msk.f32.mxu0 %vm354_vm8, %v653_v36  ;;  %2696 = vmatpush3.msra.mxu0 %v905_v22  ;;  %v1021_v36 = vrot.slane %v3368_v25, 5 }
 0x56d   :  { %v655_v37 = vmul.f32 %v2869_v42, %v2857_v17  ;;  %v3404_v42 = vld [vmem:[%s3804_s6 + $0xe] sm:$0x3] }
 0x56e   :  { %v1029_v52 = vrot.slane %v3404_v42, 1 }
 0x56f   :  { %2682 = vmatmul.mubr.msk.f32.gmra.mxu0 %vm354_vm8, %v655_v37  ;;  %v1023_v37 = vrot.slane %v3379_v27, 4 }
 0x59a   :  { %v2664_v38 = vpop.f32.mrf.mxu0 }
 0x59b   :  { %v500_v41 = vmul.f32 %v2664_v38, %v3204_v49  ;;  %v904_v38 = vld [vmem:[%s3803_s8 + $0x10] sm:$0xff] }
 0x59c   :  { %v480_v40 = vpop.f32.mrf.mxu0  ;;  %2697 = vmatprep.subr.mxu0 %v904_v38 }
 0x59d   :  { %v499_v43 = vmul.f32 %v480_v40, %v3195_v46  ;;  %v903_v40 = vld [vmem:[%s3803_s8 + $0x8] sm:$0xff]  ;;  %2698 = vmatpush3.msra.mxu0 %v904_v38 }
 0x59e   :  { %2699 = vmatprep.subr.mxu0 %v903_v40 }
 0x59f   :  { %v503_v45 = vadd.f32 %v500_v41, %v499_v43  ;;  %v1018_v41 = vsel %vm115_vm0, %v1017_v31, %v3374_v26  ;;  %v1025_v43 = vrot.slane %v3384_v28, 3  ;;  %2700 = vmatpush3.msra.mxu0 %v903_v40 }
 0x5a1   :  { %v504_v48 = vadd.f32 %v503_v45, %v501_v44  ;;  %v3420_v44 = vld [vmem:[%s3804_s6 + $0x12] sm:$0x3]  ;;  %v1020_v45 = vsel %vm118_vm1, %v1019_v32, %v1018_v41 }
 0x5a3   :  { %v505_v50 = vadd.f32 %v504_v48, %v502_v47  ;;  %v1027_v47 = vrot.slane %v3395_v30, 2  ;;  %v1031_v48 = vrot.slane %v3420_v44, 7 }
 0x5a5   :  { %2692 = vmatprep.mubr.msk.f32.mxu1 %vm162_vm7, %v505_v50  ;;  %v1022_v50 = vsel %vm121_vm2, %v1021_v36, %v1020_v45 }
 0x5a6   :  { %v1024_v33 = vsel %vm124_vm3, %v1023_v37, %v1022_v50 }
 0x5a7   :  { %v1026_v34 = vsel %vm127_vm4, %v1025_v43, %v1024_v33 }
 0x62b   :  { %v2680_v55 = vpop.f32.mrf.mxu0 }
 0x62c   :  { %v757_v61 = vmul.f32 %v2680_v55, %v3204_v49  ;;  %v1028_v55 = vsel %vm130_vm5, %v1027_v47, %v1026_v34 }
 0x62d   :  { %v737_v56 = vpop.f32.mrf.mxu0 }
 0x62e   :  { %v756_v58 = vmul.f32 %v737_v56, %v3195_v46  ;;  %v1032_v56 = vsel %vm115_vm0, %v1031_v48, %v3432_v54 }
 0x62f   :  { %v2683_v60 = vpop.f32.mrf.mxu0 }
 0x630   :  { %v760_v59 = vadd.f32 %v757_v61, %v756_v58  ;;  %v759_v0 = vmul.f32 %v2683_v60, %v3218_v53  ;;  %v1030_v58 = vsel %vm133_vm6, %v1029_v52, %v1028_v55  ;;  %v902_v60 = vld [vmem:[%s3803_s8] sm:$0xff]  ;;  %s3806_s8 = sld [smem:[#allocation17_spill]] }
 0x631   :  { %v747_v62 = vpop.f32.mrf.mxu0  ;;  %2701 = vmatprep.subr.mxu0 %v902_v60 }
 0x632   :  { %v758_v63 = vmul.f32 %v747_v62, %v3210_v51  ;;  %2702 = vmatpush3.msra.mxu0 %v902_v60 }
 0x634   :  { %v761_v1 = vadd.f32 %v760_v59, %v758_v63 }
 0x636   :  { %v762_v2 = vadd.f32 %v761_v1, %v759_v0 }
 0x638   :  { %2693 = vmatmul.mubr.msk.f32.vlgmr.msra.gmra.mxu1 %vm162_vm7, %v762_v2 }
 0x639   :  { %2707 = vmatpush3.msra.mxu1 %v3338_v19  ;;  %2714 = vmatprep.mubr.msk.f32.mxu1 %vm162_vm7, %v1030_v58 }
 0x63a   :  { %2708 = vmatprep.subr.mxu1 %v3343_v20 }
 0x63b   :  { %2709 = vmatpush3.msra.mxu1 %v3343_v20 }
 0x63c   :  { %2710 = vmatprep.subr.mxu1 %v3349_v21 }
 0x63d   :  { %2711 = vmatpush3.msra.mxu1 %v3349_v21 }
 0x63e   :  { %2712 = vmatprep.subr.mxu1 %v3390_v29 }
 0x63f   :  { %2713 = vmatpush3.msra.mxu1 %v3390_v29 }
 0x640   :  { %2715 = vmatmul.mubr.msk.f32.vlgmr.msra.gmra.mxu1 %vm162_vm7, %v1032_v56 }
 0x6f8   :  { %v2694_v57 = vpop.f32.mrf.mxu1 }
 0x6f9   :  { %v852_v5 = vadd.f32 %v2694_v57, %v2490_v3  ;;  %v2493_v57 = vld [vmem:[%s3805_s11] ss:$0 sm:$0xff] }
 0x6fa   :  { %v846_v4 = vpop.f32.mrf.mxu1 }
 0x6fb   :  { %v847_v6 = vadd.f32 %v2490_v3, %v846_v4  ;;  %v856_v9 = vadd.f32 %v852_v5, %v3182_v39  ;;  %v2494_v4 = vld [vmem:[%s3806_s8] ss:$0 sm:$0xff] }
 0x6fd   :  { %v855_v7 = vadd.f32 %v847_v6, %v3174_v35  ;;  %v862_v10 = vsel %vm162_vm7, %v856_v9, 0.0 }
 0x6ff   :  { %v859_v8 = vsel %vm162_vm7, %v855_v7, 0.0 }
 0x700   :  { %860 = vadd.xlane.f32.xlu0 %v859_v8 }
 0x704   :  { %863 = vadd.xlane.f32.xlu0 %v862_v10 }
 0x789   :  { %v861_v11 = vpop.xlane.xlu0 %860 }
 0x78a   :  { %v866_v12 = vmul.f32 0.03125, %v861_v11  ;;  %v3464_v11 = vld [vmem:[%s3758_s13] ss:$0 sm:$0xff] }
 0x78c   :  { %v3325_v13 = vsub.f32 %v855_v7, %v866_v12  ;;  %v2716_v12 = vpop.f32.mrf.mxu1 }
 0x78d   :  { %v864_v14 = vpop.xlane.xlu0 %863 }
 0x78e   :  { %v867_v15 = vmul.f32 0.03125, %v864_v14  ;;  %v870_v16 = vmul.f32 %v3325_v13, %v3325_v13  ;;  %v1103_v14 = vpop.f32.mrf.mxu1 }
 0x790   :  { %v3329_v17 = vsub.f32 %v856_v9, %v867_v15  ;;  %v872_v35 = vsel %vm162_vm7, %v870_v16, 0.0  ;;  %v1104_v15 = vadd.f32 %v3464_v11, %v1103_v14 }
 0x791   :  { %873 = vadd.xlane.f32.xlu0 %v872_v35 }
 0x792   :  { %v871_v39 = vmul.f32 %v3329_v17, %v3329_v17 }
 0x794   :  { %v875_v18 = vsel %vm162_vm7, %v871_v39, 0.0 }
 0x795   :  { %876 = vadd.xlane.f32.xlu0 %v875_v18 }
 0x81a   :  { %v874_v61 = vpop.xlane.xlu0 %873 }
 0x81b   :  { %v878_v62 = vmul.f32 0.03125, %v874_v61 }
 0x81d   :  { %v880_v59 = vadd.f32 1e-06, %v878_v62 }
 0x81e   :  { %v877_v63 = vpop.xlane.xlu0 %876 }
 0x81f   :  { %2870 = vrsqrt.f32 %v880_v59  ;;  %v879_v0 = vmul.f32 0.03125, %v877_v63 }
 0x821   :  { %v881_v1 = vadd.f32 1e-06, %v879_v0 }
 0x823   :  { %2872 = vrsqrt.f32 %v881_v1 }
 0x82c   :  { %v2871_v2 = vpop.eup %2870 }
 0x82d   :  { %v884_v3 = vmul.f32 %v2871_v2, %v3325_v13  ;;  %v3467_v13 = vadd.f32 %v2716_v12, %v3464_v11 }
 0x82f   :  { %v892_v5 = vmul.f32 %v2493_v57, %v884_v3  ;;  %2717 = vmatprep.subr.msk.mxu0 %vm162_vm7, %v3467_v13 }
 0x830   :  { %v2873_v6 = vpop.eup %2872 }
 0x831   :  { %v885_v7 = vmul.f32 %v2873_v6, %v3329_v17  ;;  %v3453_v8 = vadd.f32 %v2494_v4, %v892_v5  ;;  %v2495_v17 = vld [vmem:[%s3807_s0] ss:$0 sm:$0xff] }
 0x833   :  { %v893_v9 = vmul.f32 %v2493_v57, %v885_v7  ;;  %2703 = vmatprep.mubr.msk.f32.mxu0 %vm162_vm7, %v3453_v8 }
 0x835   :  { %v3457_v10 = vadd.f32 %v2494_v4, %v893_v9 }
 0x837   :  { %2704 = vmatmul.mubr.msk.f32.vlgmr.msra.gmra.mxu0 %vm162_vm7, %v3457_v10 }
 0x838   :  { %2718 = vmatpush3.xpose.msk.msra.mxu0 %vm162_vm7, %v3467_v13 }
 0x839   :  { %2719 = vmatprep.subr.msk.mxu0 %vm162_vm7, %v1104_v15 }
 0x83c   :  { %2720 = vmatpush3.xpose.msk.msra.mxu0 %vm162_vm7, %v1104_v15 }
 0x8f7   :  { %v2705_v16 = vpop.f32.mrf.mxu0 }
 0x8f8   :  { %v991_v18 = vadd.f32 %v2705_v16, %v2495_v17  ;;  %v1380_v16 = vrot.slane %v3374_v26, 1 }
 0x8f9   :  { %v985_v35 = vpop.f32.mrf.mxu0 }
 0x8fa   :  { %v986_v39 = vadd.f32 %v2495_v17, %v985_v35  ;;  %v3481_v36 = vmul.f32 0.35355338, %v991_v18  ;;  %v1382_v35 = vrot.slane %v3363_v24, 7 }
 0x8fc   :  { %v994_v22 = vmul.f32 0.35355338, %v986_v39  ;;  %v1475_v40 = vmul.f32 %v3481_v36, %v3195_v46  ;;  %v1381_v39 = vsel %vm115_vm0, %v3358_v23, %v1380_v16  ;;  %v1388_v23 = vrot.slane %v3384_v28, 4 }
 0x8fd   :  { %v1392_v28 = vrot.slane %v3404_v42, 2 }
 0x8fe   :  { %v1113_v31 = vmul.f32 %v994_v22, %v3204_v49  ;;  %v1112_v32 = vmul.f32 %v994_v22, %v3195_v46  ;;  %v1114_v37 = vmul.f32 %v994_v22, %v3210_v51  ;;  %v1115_v38 = vmul.f32 %v994_v22, %v3218_v53 }
 0x8ff   :  { %v1384_v22 = vrot.slane %v3368_v25, 6 }
 0x900   :  { %2721 = vmatprep.mubr.msk.f32.mxu0 %vm162_vm7, %v1112_v32  ;;  %v1386_v32 = vrot.slane %v3379_v27, 5  ;;  %v1390_v27 = vrot.slane %v3395_v30, 3  ;;  %v1394_v30 = vrot.slane %v3432_v54, 1 }
 0x901   :  { %2722 = vmatmul.mubr.msk.f32.vlgmr.msra.gmra.mxu0 %vm162_vm7, %v1113_v31  ;;  %v1383_v31 = vsel %vm118_vm1, %v1382_v35, %v1381_v39 }
 0x902   :  { %2724 = vmatprep.mubr.msk.f32.mxu0 %vm162_vm7, %v1114_v37  ;;  %v1385_v26 = vsel %vm121_vm2, %v1384_v22, %v1383_v31  ;;  %vm2270_vm2 = vcmask 73728  }
 0x905   :  { %2725 = vmatmul.mubr.msk.f32.gmra.mxu0 %vm162_vm7, %v1115_v38 }
 0x906   :  { %2752 = vmatprep.mubr.msk.f32.mxu0 %vm162_vm7, %v1475_v40 }
 0x9c1   :  { %v2723_v41 = vpop.f32.mrf.mxu0 }
 0x9c2   :  { %v1223_v43 = vsel %vm1219_vm9, %v2723_v41, -inf }
 0x9c3   :  { %1224 = vmax.xlane.f32.xlu0 %v1223_v43  ;;  %v1200_v45 = vpop.f32.mrf.mxu0 }
 0x9c4   :  { %v1220_v47 = vsel %vm1219_vm9, %v1200_v45, -inf }
 0x9c5   :  { %1221 = vmax.xlane.f32.xlu1 %v1220_v47  ;;  %v2726_v48 = vpop.f32.mrf.mxu0 }
 0x9c6   :  { %v1229_v33 = vsel %vm1219_vm9, %v2726_v48, -inf }
 0x9c7   :  { %v1210_v50 = vpop.f32.mrf.mxu0 }
 0x9c8   :  { %v1226_v52 = vsel %vm1219_vm9, %v1210_v50, -inf }
 0x9c9   :  { %1227 = vmax.xlane.f32.xlu0 %v1226_v52 }
 0x9cd   :  { %1230 = vmax.xlane.f32.xlu0 %v1229_v33 }
 0x9d6   :  { %1264 = vrot.lane.b32.xlu1 %v1104_v15, %s2974_s4 }
 0xa4c   :  { %v1225_v34 = vpop.xlane.xlu0 %1224 }
 0xa4d   :  { %v1233_v55 = vsub.f32 %v2723_v41, %v1225_v34  ;;  %v1387_v41 = vsel %vm124_vm3, %v1386_v32, %v1385_v26 }
 0xa4e   :  { %v1222_v56 = vpop.xlane.xlu1 %1221  ;;  %v1389_v43 = vsel %vm127_vm4, %v1388_v23, %v1387_v41  ;;  %vm2417_vm4 = vcmask 74752  }
 0xa4f   :  { %v1238_v58 = vmul.f32 1.442695, %v1233_v55  ;;  %v1232_v60 = vsub.f32 %v1200_v45, %v1222_v56  ;;  %v1391_v47 = vsel %vm130_vm5, %v1390_v27, %v1389_v43 }
 0xa51   :  { %2874 = vpow2.f32 %v1238_v58  ;;  %v1236_v61 = vmul.f32 1.442695, %v1232_v60 }
 0xa52   :  { %v1228_v62 = vpop.xlane.xlu0 %1227  ;;  %v1265_v40 = vpop.permute.xlu1 %1264 }
 0xa53   :  { %2876 = vpow2.f32 %v1236_v61  ;;  %v1234_v59 = vsub.f32 %v1210_v50, %v1228_v62 }
 0xa55   :  { %v1240_v1 = vmul.f32 1.442695, %v1234_v59 }
 0xa56   :  { %v1231_v63 = vpop.xlane.xlu0 %1230 }
 0xa57   :  { %v1235_v0 = vsub.f32 %v2726_v48, %v1231_v63 }
 0xa59   :  { %v1242_v2 = vmul.f32 1.442695, %v1235_v0 }
 0xa5b   :  { %2878 = vpow2.f32 %v1242_v2 }
 0xa5c   :  { %2880 = vpow2.f32 %v1240_v1  ;;  %v1476_v1 = vmul.f32 %v3481_v36, %v3204_v49 }
 0xa5e   :  { %v2875_v57 = vpop.eup %2874 }
 0xa5f   :  { %v1247_v3 = vsel %vm1219_vm9, %v2875_v57, 0.0 }
 0xa60   :  { %v2877_v4 = vpop.eup %2876  ;;  %1248 = vadd.xlane.f32.xlu0 %v1247_v3 }
 0xa61   :  { %v1244_v5 = vsel %vm1219_vm9, %v2877_v4, 0.0 }
 0xa64   :  { %1245 = vadd.xlane.f32.xlu0 %v1244_v5 }
 0xa68   :  { %v2879_v6 = vpop.eup %2878 }
 0xa69   :  { %v1253_v7 = vsel %vm1219_vm9, %v2879_v6, 0.0  ;;  %v2881_v9 = vpop.eup %2880 }
 0xa6a   :  { %1254 = vadd.xlane.f32.xlu0 %v1253_v7  ;;  %v1250_v12 = vsel %vm1219_vm9, %v2881_v9, 0.0 }
 0xa6e   :  { %1251 = vadd.xlane.f32.xlu0 %v1250_v12 }
 0xa84   :  { %1266 = vrot.lane.b32.xlu0 %v3467_v13, %s2974_s4 }
 0xae9   :  { %v1249_v14 = vpop.xlane.xlu0 %1248 }
 0xaea   :  { %2882 = vrcp.f32 %v1249_v14 }
 0xaed   :  { %v1246_v15 = vpop.xlane.xlu0 %1245 }
 0xaee   :  { %2884 = vrcp.f32 %v1246_v15 }
 0xaf3   :  { %v1255_v17 = vpop.xlane.xlu0 %1254 }
 0xaf4   :  { %2886 = vrcp.f32 %v1255_v17 }
 0xaf7   :  { %v1252_v18 = vpop.xlane.xlu0 %1251  ;;  %v2883_v13 = vpop.eup %2882 }
 0xaf8   :  { %2888 = vrcp.f32 %v1252_v18  ;;  %v1259_v25 = vmul.f32 %v2883_v13, %v2875_v57  ;;  %v1478_v57 = vmul.f32 %v3481_v36, %v3218_v53 }
 0xafb   :  { %v2885_v37 = vpop.eup %2884  ;;  %v1267_v38 = vpop.permute.xlu0 %1266 }
 0xafc   :  { %2727 = vmatprep.subr.msk.mxu1 %vm1281_vm10, %v1267_v38  ;;  %v1257_v24 = vmul.f32 %v2885_v37, %v2877_v4 }
 0xafd   :  { %2728 = vmatpush3.msk.msra.mxu1 %vm1281_vm10, %v1267_v38 }
 0xafe   :  { %2729 = vmatprep.subr.mxu1 %v1265_v40  ;;  %2731 = vmatprep.mubr.msk.f32.mxu1 %vm1219_vm9, %v1257_v24  ;;  %v1374_v50 = vadd.f32 %v1259_v25, %v1257_v24 }
 0xaff   :  { %2730 = vmatpush3.msra.mxu1 %v1265_v40 }
 0xb00   :  { %2732 = vmatmul.mubr.msk.f32.vlgmr.msra.gmra.mxu1 %vm1219_vm9, %v1259_v25  ;;  %2737 = vmatprep.subr.mxu1 %v3338_v19 }
 0xb01   :  { %2738 = vmatpush3.msra.mxu1 %v3338_v19  ;;  %v2887_v45 = vpop.eup %2886 }
 0xb02   :  { %2739 = vmatprep.subr.mxu1 %v3343_v20  ;;  %v1263_v52 = vmul.f32 %v2887_v45, %v2879_v6 }
 0xb03   :  { %2740 = vmatpush3.msra.mxu1 %v3343_v20  ;;  %v1393_v20 = vsel %vm133_vm6, %v1392_v28, %v1391_v47 }
 0xb04   :  { %2741 = vmatprep.subr.mxu1 %v3349_v21 }
 0xb05   :  { %v2889_v48 = vpop.eup %2888  ;;  %2742 = vmatpush3.msra.mxu1 %v3349_v21  ;;  %v1395_v21 = vsel %vm115_vm0, %v3420_v44, %v1394_v30 }
 0xb06   :  { %v1261_v19 = vmul.f32 %v2889_v48, %v2881_v9  ;;  %2743 = vmatprep.subr.mxu1 %v3390_v29 }
 0xb07   :  { %2744 = vmatpush3.msra.mxu1 %v3390_v29 }
 0xb08   :  { %2734 = vmatprep.mubr.msk.f32.mxu1 %vm1219_vm9, %v1261_v19  ;;  %v1376_v42 = vadd.f32 %v1374_v50, %v1261_v19 }
 0xb09   :  { %2735 = vmatmul.mubr.msk.f32.gmra.mxu1 %vm1219_vm9, %v1263_v52 }
 0xb0a   :  { %v1378_v33 = vadd.f32 %v1376_v42, %v1263_v52  ;;  %2745 = vmatprep.mubr.msk.f32.mxu1 %vm162_vm7, %v1393_v20 }
 0xb0c   :  { %v3536_v54 = vmul.f32 0.25, %v1378_v33 }
 0xb0d   :  { %2746 = vmatmul.mubr.msk.f32.vlgmr.msra.gmra.mxu1 %vm162_vm7, %v1395_v21 }
 0xb0e   :  { %2168 = vst.msk [vmem:[#allocation2] sm:$0xff] %vm1219_vm9, %v3536_v54 }
 0xbc0   :  { %v2733_v29 = vpop.f32.mrf.mxu1 }
 0xbc1   :  { %v1370_v59 = vmul.f32 %v2733_v29, %v3204_v49 }
 0xbc2   :  { %v1350_v34 = vpop.f32.mrf.mxu1 }
 0xbc3   :  { %v1369_v44 = vmul.f32 %v1350_v34, %v3195_v46 }
 0xbc5   :  { %v1373_v0 = vadd.f32 %v1370_v59, %v1369_v44  ;;  %v2926_v59 = vld [vmem:[%s3798_s30] sm:$0xff] }
 0xbc9   :  { %v2736_v55 = vpop.f32.mrf.mxu1 }
 0xbca   :  { %v1372_v46 = vmul.f32 %v2736_v55, %v3218_v53 }
 0xbcb   :  { %v1360_v56 = vpop.f32.mrf.mxu1 }
 0xbcc   :  { %v1371_v63 = vmul.f32 %v1360_v56, %v3210_v51  ;;  %v1744_v56 = vld [vmem:[%s3759_s14 + $0x18] sm:$0xff] }
 0xbcd   :  { %v2747_v58 = vpop.f32.mrf.mxu1 }
 0xbce   :  { %v1472_v60 = vadd.f32 %v2747_v58, %v3464_v11  ;;  %v1375_v2 = vadd.f32 %v1373_v0, %v1371_v63  ;;  %v1743_v58 = vld [vmem:[%s3759_s14 + $0x10] sm:$0xff] }
 0xbcf   :  { %v1466_v61 = vpop.f32.mrf.mxu1 }
 0xbd0   :  { %v1467_v62 = vadd.f32 %v3464_v11, %v1466_v61  ;;  %2748 = vmatprep.subr.msk.mxu0 %vm162_vm7, %v1472_v60  ;;  %v1477_v11 = vmul.f32 %v3481_v36, %v3210_v51  ;;  %v1377_v3 = vadd.f32 %v1375_v2, %v1372_v46  ;;  %v1741_v61 = vld [vmem:[%s3759_s14] sm:$0xff] }
 0xbd1   :  { %2749 = vmatpush3.xpose.msk.msra.mxu0 %vm162_vm7, %v1472_v60 }
 0xbd2   :  { %2750 = vmatprep.subr.msk.mxu0 %vm162_vm7, %v1467_v62 }
 0xbd5   :  { %2751 = vmatpush3.xpose.msk.msra.mxu0 %vm162_vm7, %v1467_v62 }
 0xbd6   :  { %2768 = vmatprep.subr.mxu0 %v1744_v56 }
 0xbd8   :  { %2753 = vmatmul.mubr.msk.f32.vlgmr.msra.gmra.mxu0 %vm162_vm7, %v1476_v1  ;;  %v2927_v1 = vld [vmem:[%s3798_s30 + $0x8] sm:$0xff] }
 0xbd9   :  { %2755 = vmatprep.mubr.msk.f32.mxu0 %vm162_vm7, %v1477_v11  ;;  %2769 = vmatpush3.msra.mxu0 %v1744_v56 }
 0xbda   :  { %2770 = vmatprep.subr.mxu0 %v1743_v58 }
 0xbdb   :  { %2771 = vmatpush3.msra.mxu0 %v1743_v58  ;;  %v2032_v58 = vld [vmem:[%s3765_s20 + $0x38] sm:$0xff] }
 0xbdc   :  { %2756 = vmatmul.mubr.msk.f32.gmra.mxu0 %vm162_vm7, %v1478_v57  ;;  %v2928_v57 = vld [vmem:[%s3798_s30 + $0x10] sm:$0xff] }
 0xbdd   :  { %2776 = vmatprep.mubr.msk.f32.mxu0 %vm162_vm7, %v1377_v3 }
 0xc98   :  { %v2754_v4 = vpop.f32.mrf.mxu0 }
 0xc99   :  { %v1585_v49 = vsel %vm1219_vm9, %v2754_v4, -inf }
 0xc9a   :  { %1586 = vmax.xlane.f32.xlu1 %v1585_v49  ;;  %v1563_v5 = vpop.f32.mrf.mxu0 }
 0xc9b   :  { %v1582_v51 = vsel %vm1219_vm9, %v1563_v5, -inf }
 0xc9c   :  { %1583 = vmax.xlane.f32.xlu0 %v1582_v51  ;;  %v2757_v6 = vpop.f32.mrf.mxu0 }
 0xc9d   :  { %v1591_v53 = vsel %vm1219_vm9, %v2757_v6, -inf }
 0xc9e   :  { %v1573_v7 = vpop.f32.mrf.mxu0 }
 0xc9f   :  { %v1588_v9 = vsel %vm1219_vm9, %v1573_v7, -inf }
 0xca0   :  { %1589 = vmax.xlane.f32.xlu0 %v1588_v9 }
 0xca4   :  { %1592 = vmax.xlane.f32.xlu0 %v1591_v53 }
 0xd23   :  { %v1587_v36 = vpop.xlane.xlu1 %1586 }
 0xd24   :  { %v1595_v12 = vsub.f32 %v2754_v4, %v1587_v36  ;;  %v2929_v4 = vld [vmem:[%s3798_s30 + $0x18] sm:$0xff] }
 0xd25   :  { %v1584_v14 = vpop.xlane.xlu0 %1583 }
 0xd26   :  { %v1600_v15 = vmul.f32 1.442695, %v1595_v12  ;;  %v1594_v16 = vsub.f32 %v1563_v5, %v1584_v14 }
 0xd28   :  { %2890 = vpow2.f32 %v1600_v15  ;;  %v1598_v17 = vmul.f32 1.442695, %v1594_v16 }
 0xd29   :  { %v1590_v35 = vpop.xlane.xlu0 %1589 }
 0xd2a   :  { %2892 = vpow2.f32 %v1598_v17  ;;  %v1596_v39 = vsub.f32 %v1573_v7, %v1590_v35 }
 0xd2c   :  { %v1602_v18 = vmul.f32 1.442695, %v1596_v39 }
 0xd2d   :  { %v1593_v22 = vpop.xlane.xlu0 %1592 }
 0xd2e   :  { %2894 = vpow2.f32 %v1602_v18  ;;  %v1597_v31 = vsub.f32 %v2757_v6, %v1593_v22  ;;  %v2525_v6 = vld [vmem:[%s3760_s15] ss:$0 sm:$0xff] }
 0xd30   :  { %v1604_v13 = vmul.f32 1.442695, %v1597_v31 }
 0xd32   :  { %2896 = vpow2.f32 %v1604_v13 }
 0xd35   :  { %v2891_v32 = vpop.eup %2890 }
 0xd36   :  { %v1609_v37 = vsel %vm1219_vm9, %v2891_v32, 0.0 }
 0xd37   :  { %v2893_v38 = vpop.eup %2892  ;;  %1610 = vadd.xlane.f32.xlu0 %v1609_v37  ;;  %v1882_v37 = vld [vmem:[%s3763_s18 + $0x18] sm:$0xff] }
 0xd38   :  { %v1606_v26 = vsel %vm1219_vm9, %v2893_v38, 0.0 }
 0xd39   :  { %1607 = vadd.xlane.f32.xlu1 %v1606_v26  ;;  %v1880_v26 = vld [vmem:[%s3763_s18 + $0x8] sm:$0xff] }
 0xd3b   :  { %v2895_v24 = vpop.eup %2894 }
 0xd3c   :  { %v1612_v40 = vsel %vm1219_vm9, %v2895_v24, 0.0 }
 0xd3d   :  { %1613 = vadd.xlane.f32.xlu1 %v1612_v40  ;;  %v2976_v40 = vmov 0.0  }
 0xd3f   :  { %v2897_v23 = vpop.eup %2896 }
 0xd40   :  { %v1615_v25 = vsel %vm1219_vm9, %v2897_v23, 0.0 }
 0xd41   :  { %1616 = vadd.xlane.f32.xlu0 %v1615_v25 }
 0xd4e   :  { %1628 = vrot.lane.b32.xlu1 %v1472_v60, %s2974_s4  ;;  %v1742_v60 = vld [vmem:[%s3759_s14 + $0x8] sm:$0xff] }
 0xd4f   :  { %2772 = vmatprep.subr.mxu0 %v1742_v60 }
 0xd50   :  { %2773 = vmatpush3.msra.mxu0 %v1742_v60  ;;  %v2031_v60 = vld [vmem:[%s3765_s20 + $0x30] sm:$0xff] }
 0xd51   :  { %2774 = vmatprep.subr.mxu0 %v1741_v61 }
 0xd52   :  { %2775 = vmatpush3.msra.mxu0 %v1741_v61  ;;  %v2030_v61 = vld [vmem:[%s3765_s20 + $0x28] sm:$0xff] }
 0xd53   :  { %2790 = vmatprep.subr.mxu0 %v2032_v58 }
 0xd57   :  { %1626 = vrot.lane.b32.xlu0 %v1467_v62, %s2974_s4 }
 0xdc0   :  { %v1611_v41 = vpop.xlane.xlu0 %1610 }
 0xdc1   :  { %2898 = vrcp.f32 %v1611_v41 }
 0xdc2   :  { %v1608_v27 = vpop.xlane.xlu1 %1607 }
 0xdc3   :  { %2900 = vrcp.f32 %v1608_v27 }
 0xdc6   :  { %v1614_v43 = vpop.xlane.xlu1 %1613 }
 0xdc7   :  { %2902 = vrcp.f32 %v1614_v43 }
 0xdca   :  { %v1629_v28 = vpop.permute.xlu1 %1628  ;;  %v1617_v45 = vpop.xlane.xlu0 %1616 }
 0xdcb   :  { %2904 = vrcp.f32 %v1617_v45  ;;  %2758 = vmatprep.subr.msk.mxu1 %vm1281_vm10, %v1629_v28 }
 0xdcc   :  { %2759 = vmatpush3.msk.msra.mxu1 %vm1281_vm10, %v1629_v28 }
 0xdce   :  { %v1627_v47 = vpop.permute.xlu0 %1626  ;;  %v2899_v48 = vpop.eup %2898 }
 0xdcf   :  { %2760 = vmatprep.subr.mxu1 %v1627_v47  ;;  %v1621_v19 = vmul.f32 %v2899_v48, %v2891_v32  ;;  %v2528_v48 = vld [vmem:[%s3761_s16] ss:$0 sm:$0xff] }
 0xdd0   :  { %v2901_v30 = vpop.eup %2900  ;;  %2761 = vmatpush3.msra.mxu1 %v1627_v47  ;;  %v2170_v47 = vlaneseq }
 0xdd1   :  { %v1619_v50 = vmul.f32 %v2901_v30, %v2893_v38  ;;  %v1881_v38 = vld [vmem:[%s3763_s18 + $0x10] sm:$0xff]  ;;  %2779 = vmatprep.subr.mxu1 %v1882_v37 }
 0xdd3   :  { %2762 = vmatprep.mubr.msk.f32.mxu1 %vm1219_vm9, %v1619_v50  ;;  %v1735_v42 = vadd.f32 %v1621_v19, %v1619_v50 }
 0xdd4   :  { %v2903_v52 = vpop.eup %2902  ;;  %2763 = vmatmul.mubr.msk.f32.vlgmr.msra.gmra.mxu1 %vm1219_vm9, %v1621_v19 }
 0xdd5   :  { %v1623_v20 = vmul.f32 %v2903_v52, %v2895_v24  ;;  %2780 = vmatpush3.msra.mxu1 %v1882_v37  ;;  %v1879_v24 = vld [vmem:[%s3763_s18] sm:$0xff] }
 0xdd6   :  { %2781 = vmatprep.subr.mxu1 %v1881_v38 }
 0xdd7   :  { %2765 = vmatprep.mubr.msk.f32.mxu1 %vm1219_vm9, %v1623_v20  ;;  %v1737_v21 = vadd.f32 %v1735_v42, %v1623_v20  ;;  %2782 = vmatpush3.msra.mxu1 %v1881_v38  ;;  %v2171_v20 = vshrl.u32 %v2170_v47, 7  ;;  %v2173_v42 = vand.u32 127, %v2170_v47 }
 0xdd8   :  { %v2905_v33 = vpop.eup %2904  ;;  %2783 = vmatprep.subr.mxu1 %v1880_v26 }
 0xdd9   :  { %v1625_v29 = vmul.f32 %v2905_v33, %v2897_v23  ;;  %2784 = vmatpush3.msra.mxu1 %v1880_v26  ;;  %v2529_v33 = vld [vmem:[%s3762_s17] ss:$0 sm:$0xff]  ;;  %vm2174_vm11 = vcmp.le.s32.totalorder %v2173_v42, %v2171_v20  ;;  %v2978_v20 = vmov -1.0  }
 0xdda   :  { %2785 = vmatprep.subr.mxu1 %v1879_v24  ;;  %v2538_v56 = vsel %vm2174_vm11, 1.0, %v2976_v40 }
 0xddb   :  { %2766 = vmatmul.mubr.msk.f32.gmra.mxu1 %vm1219_vm9, %v1625_v29  ;;  %v1739_v34 = vadd.f32 %v1737_v21, %v1625_v29 }
 0xddc   :  { %2786 = vmatpush3.msra.mxu1 %v1879_v24 }
 0xddd   :  { %v3577_v55 = vmul.f32 0.25, %v1739_v34  ;;  %2809 = vmatprep.subr.mxu1 %v2976_v40 }
 0xddf   :  { %2169 = vst.msk [vmem:[#allocation2 + $0x8] sm:$0xff] %vm1219_vm9, %v3577_v55 }
 0xe94   :  { %v2764_v62 = vpop.f32.mrf.mxu1 }
 0xe95   :  { %v1731_v2 = vmul.f32 %v2927_v1, %v2764_v62  ;;  %v2029_v62 = vld [vmem:[%s3765_s20 + $0x20] sm:$0xff] }
 0xe96   :  { %v1711_v44 = vpop.f32.mrf.mxu1  ;;  %v2530_v1 = vld [vmem:[%s3764_s19] ss:$0 sm:$0xff] }
 0xe97   :  { %v1730_v63 = vmul.f32 %v2926_v59, %v1711_v44  ;;  %v2028_v44 = vld [vmem:[%s3765_s20 + $0x18] sm:$0xff]  ;;  %v2027_v59 = vld [vmem:[%s3765_s20 + $0x10] sm:$0xff] }
 0xe99   :  { %v1734_v46 = vadd.f32 %v1731_v2, %v1730_v63  ;;  %v2026_v63 = vld [vmem:[%s3765_s20 + $0x8] sm:$0xff] }
 0xe9b   :  { %v2767_v0 = vpop.f32.mrf.mxu1 }
 0xe9c   :  { %v1733_v49 = vmul.f32 %v2929_v4, %v2767_v0  ;;  %v2025_v0 = vld [vmem:[%s3765_s20] sm:$0xff] }
 0xe9d   :  { %v1721_v11 = vpop.f32.mrf.mxu1 }
 0xe9e   :  { %v1732_v3 = vmul.f32 %v2928_v57, %v1721_v11 }
 0xea0   :  { %v1736_v5 = vadd.f32 %v1734_v46, %v1732_v3 }
 0xea2   :  { %v1738_v51 = vadd.f32 %v1736_v5, %v1733_v49 }
 0xea4   :  { %2777 = vmatmul.mubr.msk.f32.vlgmr.msra.gmra.mxu0 %vm162_vm7, %v1738_v51 }
 0xea5   :  { %2791 = vmatpush3.msra.mxu0 %v2032_v58 }
 0xea6   :  { %2792 = vmatprep.subr.mxu0 %v2031_v60 }
 0xea7   :  { %2793 = vmatpush3.msra.mxu0 %v2031_v60 }
 0xea8   :  { %2794 = vmatprep.subr.mxu0 %v2030_v61 }
 0xea9   :  { %2795 = vmatpush3.msra.mxu0 %v2030_v61 }
 0xeaa   :  { %2796 = vmatprep.subr.mxu0 %v2029_v62 }
 0xeab   :  { %2797 = vmatpush3.msra.mxu0 %v2029_v62 }
 0xeac   :  { %2798 = vmatprep.subr.mxu0 %v2028_v44 }
 0xead   :  { %2799 = vmatpush3.msra.mxu0 %v2028_v44 }
 0xeae   :  { %2800 = vmatprep.subr.mxu0 %v2027_v59 }
 0xeaf   :  { %2801 = vmatpush3.msra.mxu0 %v2027_v59 }
 0xeb0   :  { %2802 = vmatprep.subr.mxu0 %v2026_v63 }
 0xeb1   :  { %2803 = vmatpush3.msra.mxu0 %v2026_v63 }
 0xeb2   :  { %2804 = vmatprep.subr.mxu0 %v2025_v0 }
 0xeb3   :  { %2805 = vmatpush3.msra.mxu0 %v2025_v0 }
 0xf64   :  { %v2778_v7 = vpop.f32.mrf.mxu0 }
 0xf65   :  { %v1830_v9 = vadd.f32 %v2778_v7, %v2525_v6 }
 0xf66   :  { %v1824_v53 = vpop.f32.mrf.mxu0 }
 0xf67   :  { %v1834_v36 = vadd.f32 %v1830_v9, %v3457_v10  ;;  %v1825_v12 = vadd.f32 %v2525_v6, %v1824_v53 }
 0xf69   :  { %2426 = vst.msk [vmem:[%s3770_s25 + $0x8] sm:$0xff] %vm162_vm7, %v1834_v36  ;;  %v1833_v14 = vadd.f32 %v1825_v12, %v3453_v8  ;;  %v1840_v15 = vsel %vm162_vm7, %v1834_v36, 0.0 }
 0xf6a   :  { %1841 = vadd.xlane.f32.xlu0 %v1840_v15 }
 0xf6b   :  { %2425 = vst.msk [vmem:[%s3770_s25] sm:$0xff] %vm162_vm7, %v1833_v14  ;;  %v1837_v16 = vsel %vm162_vm7, %v1833_v14, 0.0 }
 0xf6c   :  { %1838 = vadd.xlane.f32.xlu1 %v1837_v16 }
 0xff3   :  { %v1842_v10 = vpop.xlane.xlu0 %1841 }
 0xff4   :  { %v1844_v17 = vmul.f32 0.03125, %v1842_v10 }
 0xff5   :  { %v1839_v35 = vpop.xlane.xlu1 %1838 }
 0xff6   :  { %v1846_v39 = vsub.f32 %v1834_v36, %v1844_v17  ;;  %v1843_v18 = vmul.f32 0.03125, %v1839_v35 }
 0xff8   :  { %v1845_v22 = vsub.f32 %v1833_v14, %v1843_v18  ;;  %v1848_v31 = vmul.f32 %v1846_v39, %v1846_v39 }
 0xffa   :  { %v1852_v8 = vsel %vm162_vm7, %v1848_v31, 0.0  ;;  %v1847_v13 = vmul.f32 %v1845_v22, %v1845_v22 }
 0xffb   :  { %1853 = vadd.xlane.f32.xlu0 %v1852_v8 }
 0xffc   :  { %v1849_v32 = vsel %vm162_vm7, %v1847_v13, 0.0 }
 0xffd   :  { %1850 = vadd.xlane.f32.xlu1 %v1849_v32 }
0x1084   :  { %v1854_v23 = vpop.xlane.xlu0 %1853 }
0x1085   :  { %v1856_v25 = vmul.f32 0.03125, %v1854_v23 }
0x1086   :  { %v1851_v41 = vpop.xlane.xlu1 %1850 }
0x1087   :  { %v1858_v27 = vadd.f32 1e-06, %v1856_v25  ;;  %v1855_v43 = vmul.f32 0.03125, %v1851_v41 }
0x1089   :  { %2906 = vrsqrt.f32 %v1858_v27  ;;  %v1857_v28 = vadd.f32 1e-06, %v1855_v43 }
0x108b   :  { %2908 = vrsqrt.f32 %v1857_v28 }
0x1096   :  { %v2907_v45 = vpop.eup %2906 }
0x1097   :  { %v1862_v30 = vmul.f32 %v2907_v45, %v1846_v39 }
0x1098   :  { %v2909_v50 = vpop.eup %2908 }
0x1099   :  { %v1861_v19 = vmul.f32 %v2909_v50, %v1845_v22  ;;  %v1870_v52 = vmul.f32 %v2528_v48, %v1862_v30 }
0x109b   :  { %v1869_v21 = vmul.f32 %v2528_v48, %v1861_v19  ;;  %v3643_v34 = vadd.f32 %v2529_v33, %v1870_v52 }
0x109d   :  { %v3641_v29 = vadd.f32 %v2529_v33, %v1869_v21 }
0x109f   :  { %2787 = vmatprep.mubr.msk.f32.mxu1 %vm162_vm7, %v3641_v29 }
0x10a0   :  { %2788 = vmatmul.mubr.msk.f32.vlgmr.msra.gmra.mxu1 %vm162_vm7, %v3643_v34 }
0x10a1   :  { %2810 = vmatpush3.msra.mxu1 %v3536_v54  ;;  %2811 = vmatprep.mubr.msk.f32.mxu1 %vm2977_vm12, %v2976_v40 }
0x10a2   :  { %2814 = vmatprep.subr.mxu1 %v2976_v40 }
0x10a4   :  { %2812 = vmatmul.mubr.msk.f32.vlgmr.msra.gmra.mxu1 %vm354_vm8, %v2538_v56 }
0x10a5   :  { %2815 = vmatpush3.msra.mxu1 %v3577_v55  ;;  %2816 = vmatprep.mubr.msk.f32.mxu1 %vm2977_vm12, %v2976_v40 }
0x10a8   :  { %2817 = vmatmul.mubr.msk.f32.vlgmr.msra.gmra.mxu1 %vm354_vm8, %v2538_v56 }
0x1160   :  { %v2789_v2 = vpop.f32.mrf.mxu1 }
0x1161   :  { %v1968_v11 = vadd.f32 %v2789_v2, %v2530_v1 }
0x1162   :  { %v1962_v46 = vpop.f32.mrf.mxu1 }
0x1163   :  { %v1974_v57 = vmul.f32 0.70710677, %v1968_v11  ;;  %v1963_v3 = vadd.f32 %v2530_v1, %v1962_v46  ;;  %v1972_v59 = vmul.f32 0.5, %v1968_v11  ;;  %v2263_v1 = vsel %vm1219_vm9, %v3536_v54, -inf  ;;  %v2533_v11 = vld [vmem:[%s3766_s21] ss:$0 sm:$0xff] }
0x1164   :  { %v3680_v4 = vpop.f32.mrf.mxu1  ;;  %v2264_v2 = vrot.slane %v2263_v1, 4  ;;  %v2365_v46 = vsel %vm1219_vm9, %v3577_v55, -inf  ;;  %s2979_s21 = smov [#allocation2]  }
0x1165   :  { %v1980_v49 = vand.u32 2147483647, %v1974_v57  ;;  %v1973_v5 = vmul.f32 0.70710677, %v1963_v3  ;;  %vm1976_vm13 = vcmp.ge.f32.partialorder %v1974_v57, 0.0  ;;  %v1971_v62 = vmul.f32 0.5, %v1963_v3 }
0x1166   :  { %v2813_v51 = vpop.f32.mrf.mxu1  ;;  %v1978_v42 = vsel %vm1976_vm13, 1.0, %v2978_v20  ;;  %v2265_v57 = vmax.f32 %v2263_v1, %v2264_v2  ;;  %vm2250_vm1 = vcmp.lt.f32.partialorder %v3536_v54, %v3680_v4  ;;  %s2436_s3 = sshll.u32 %s2979_s21, 4  ;;  %s2437_s3 = int_to_ptr.vmem [resolvable:$true] %s2436_s3 }
0x1167   :  { %v1982_v6 = vmul.f32 0.3275911, %v1980_v49  ;;  %v1979_v7 = vand.u32 2147483647, %v1973_v5  ;;  %v2008_v15 = vsub.f32 0.0, %v1980_v49  ;;  %vm1975_vm14 = vcmp.ge.f32.partialorder %v1973_v5, 0.0  ;;  %p2935_p1 = scmp.lt.s32.totalorder %s2437_s3, %s2437_s3 }
0x1168   :  { %v3682_v9 = vpop.f32.mrf.mxu1  ;;  %v1977_v58 = vsel %vm1975_vm14, 1.0, %v2978_v20  ;;  %v2266_v5 = vrot.slane %v2265_v57, 2  ;;  %s2930_s13 = scalar_lea.vmem %s2437_s3, 256 }
0x1169   :  { %v1984_v53 = vadd.f32 1.0, %v1982_v6  ;;  %v1981_v36 = vmul.f32 0.3275911, %v1979_v7  ;;  %v2007_v16 = vsub.f32 0.0, %v1979_v7  ;;  %v2010_v10 = vmul.f32 %v2008_v15, %v1980_v49  ;;  %p2931_p0 = scmp.ne.s32.totalorder %s2437_s3, %s2930_s13  ;;  %p2936_p2 = scmp.lt.s32.totalorder %s2930_s13, %s2930_s13 }
0x116a   :  { %v2818_v12 = vpop.f32.mrf.mxu1  ;;  %v2366_v49 = vrot.slane %v2365_v46, 4  ;;  %v2267_v6 = vmax.f32 %v2265_v57, %v2266_v5  ;;  %vm2352_vm3 = vcmp.lt.f32.partialorder %v3577_v55, %v3682_v9 }
0x116b   :  { %2910 = vrcp.f32 %v1984_v53  ;;  %v1983_v14 = vadd.f32 1.0, %v1981_v36  ;;  %v2009_v35 = vmul.f32 %v2007_v16, %v1979_v7  ;;  %v2013_v18 = vmul.f32 1.442695, %v2010_v10  ;;  %p2937_p3 = por %p2936_p2, %p2935_p1 }
0x116c   :  { %v2367_v51 = vmax.f32 %v2365_v46, %v2366_v49  ;;  %v2268_v53 = vrot.slane %v2267_v6, 1 }
0x116d   :  { %2912 = vrcp.f32 %v1983_v14  ;;  %v2011_v13 = vmul.f32 1.442695, %v2009_v35  ;;  %p2938_p4 = pnand %p2937_p3, %p2931_p0 }
0x116e   :  { %2914 = vpow2.f32 %v2013_v18  ;;  %v2368_v3 = vrot.slane %v2367_v51, 2  ;;  %v2269_v10 = vmax.f32 %v2267_v6, %v2268_v53 }
0x116f   :  { %2916 = vpow2.f32 %v2011_v13 }
0x1170   :  { %v2369_v12 = vmax.f32 %v2367_v51, %v2368_v3 }
0x1178   :  { %v2911_v17 = vpop.eup %2910 }
0x1179   :  { %v1990_v39 = vmul.f32 1.0614054, %v2911_v17 }
0x117a   :  { %v2913_v22 = vpop.eup %2912 }
0x117b   :  { %v1992_v31 = vadd.f32 -1.4531521, %v1990_v39  ;;  %v1989_v8 = vmul.f32 1.0614054, %v2913_v22  ;;  %v2915_v47 = vpop.eup %2914  ;;  %v2370_v39 = vrot.slane %v2369_v12, 1 }
0x117c   :  { %v2917_v19 = vpop.eup %2916 }
0x117d   :  { %v1994_v32 = vmul.f32 %v2911_v17, %v1992_v31  ;;  %v1991_v37 = vadd.f32 -1.4531521, %v1989_v8  ;;  %v2371_v31 = vmax.f32 %v2369_v12, %v2370_v39 }
0x117f   :  { %v1996_v38 = vadd.f32 1.4214138, %v1994_v32  ;;  %v1993_v26 = vmul.f32 %v2913_v22, %v1991_v37  ;;  %v2372_v13 = vsel %vm2270_vm2, %v2371_v31, 0.0  ;;  %v2393_v37 = vsel %vm1219_vm9, %v3536_v54, 0.0 }
0x1181   :  { %v1998_v24 = vmul.f32 %v2911_v17, %v1996_v38  ;;  %v1995_v40 = vadd.f32 1.4214138, %v1993_v26  ;;  %v2394_v26 = vrot.slane %v2393_v37, 4 }
0x1183   :  { %v2000_v23 = vadd.f32 -0.28449672, %v1998_v24  ;;  %v1997_v25 = vmul.f32 %v2913_v22, %v1995_v40  ;;  %v2395_v40 = vadd.f32 %v2394_v26, %v2393_v37 }
0x1185   :  { %v2002_v41 = vmul.f32 %v2911_v17, %v2000_v23  ;;  %v1999_v27 = vadd.f32 -0.28449672, %v1997_v25  ;;  %v2396_v25 = vrot.slane %v2395_v40, 2 }
0x1187   :  { %v2004_v43 = vadd.f32 0.2548296, %v2002_v41  ;;  %v2001_v28 = vmul.f32 %v2913_v22, %v1999_v27  ;;  %v2397_v27 = vadd.f32 %v2396_v25, %v2395_v40 }
0x1189   :  { %v2006_v45 = vmul.f32 %v2911_v17, %v2004_v43  ;;  %v2003_v48 = vadd.f32 0.2548296, %v2001_v28  ;;  %v2398_v43 = vrot.slane %v2397_v27, 1 }
0x118b   :  { %v2016_v30 = vmul.f32 %v2915_v47, %v2006_v45  ;;  %v2005_v50 = vmul.f32 %v2913_v22, %v2003_v48  ;;  %v2251_v22 = vsel %vm2250_vm1, %v3536_v54, %v3680_v4  ;;  %v2400_v4 = vsel %vm1219_vm9, %v3577_v55, 0.0 }
0x118c   :  { %v2252_v8 = vsel %vm1219_vm9, %v2251_v22, 0.0  ;;  %v2401_v38 = vrot.slane %v2400_v4, 4  ;;  %v2399_v45 = vadd.f32 %v2398_v43, %v2397_v27 }
0x118d   :  { %v2018_v52 = vsub.f32 1.0, %v2016_v30  ;;  %v2015_v33 = vmul.f32 %v2917_v19, %v2005_v50 }
0x118e   :  { %v2402_v24 = vadd.f32 %v2401_v38, %v2400_v4  ;;  %v2407_v48 = vmin.f32 %v2399_v45, 1.0 }
0x118f   :  { %v2020_v21 = vmul.f32 %v2018_v52, %v1978_v42  ;;  %v2017_v56 = vsub.f32 1.0, %v2015_v33 }
0x1190   :  { %v2403_v23 = vrot.slane %v2402_v24, 2 }
0x1191   :  { %v2019_v60 = vmul.f32 %v2017_v56, %v1977_v58  ;;  %v2022_v61 = vadd.f32 1.0, %v2020_v21 }
0x1192   :  { %v2404_v41 = vadd.f32 %v2403_v23, %v2402_v24 }
0x1193   :  { %v2021_v44 = vadd.f32 1.0, %v2019_v60  ;;  %v2024_v0 = vmul.f32 %v2022_v61, %v1972_v59 }
0x1195   :  { %v2023_v63 = vmul.f32 %v2021_v44, %v1971_v62 }
0x1197   :  { %2806 = vmatprep.mubr.msk.f32.mxu0 %vm2040_vm15, %v2023_v63 }
0x1198   :  { %2807 = vmatmul.mubr.msk.f32.vlgmr.msra.gmra.mxu0 %vm2040_vm15, %v2024_v0 }
0x1258   :  { %v2808_v7 = vpop.f32.mrf.mxu0 }
0x1259   :  { %v2119_v36 = vadd.f32 %v2808_v7, %v2533_v11 }
0x125a   :  { %v2113_v14 = vpop.f32.mrf.mxu0 }
0x125b   :  { %v2114_v15 = vadd.f32 %v2533_v11, %v2113_v14  ;;  %v2123_v16 = vadd.f32 %v2119_v36, %v3643_v34  ;;  %v2271_v34 = vsel %vm2270_vm2, %v2269_v10, 0.0 }
0x125d   :  { %v2129_v17 = vsel %vm162_vm7, %v2123_v16, 0.0  ;;  %v2122_v35 = vadd.f32 %v2114_v15, %v3641_v29  ;;  %v2353_v29 = vsel %vm2352_vm3, %v3577_v55, %v3682_v9  ;;  %v2405_v9 = vrot.slane %v2404_v41, 1 }
0x125e   :  { %2130 = vadd.xlane.f32.xlu0 %v2129_v17  ;;  %v2354_v32 = vsel %vm1219_vm9, %v2353_v29, 0.0 }
0x125f   :  { %v2126_v18 = vsel %vm162_vm7, %v2122_v35, 0.0  ;;  %v2406_v28 = vadd.f32 %v2405_v9, %v2404_v41 }
0x1260   :  { %2127 = vadd.xlane.f32.xlu1 %v2126_v18 }
0x1261   :  { %v2408_v47 = vmin.f32 %v2406_v28, 1.0 }
0x1262   :  { %2272 = vadd.xlane.f32.xlu0 %v2271_v34 }
0x1263   :  { %2918 = vlog2.f32 %v2408_v47 }
0x1264   :  { %2253 = vadd.xlane.f32.xlu1 %v2252_v8  ;;  %2920 = vlog2.f32 %v2407_v48 }
0x1266   :  { %2373 = vadd.xlane.f32.xlu0 %v2372_v13 }
0x1268   :  { %2355 = vadd.xlane.f32.xlu1 %v2354_v32 }
0x1270   :  { %v2919_v54 = vpop.eup %2918 }
0x1271   :  { %v2921_v42 = vpop.eup %2920  ;;  %v2412_v60 = vmul.f32 0.6931472, %v2919_v54 }
0x1272   :  { %v2410_v0 = vmul.f32 0.6931472, %v2921_v42 }
0x1274   :  { %v2415_v5 = vsel %vm115_vm0, %v2412_v60, %v2410_v0 }
0x1275   :  { %v2418_v36 = vsel %vm2417_vm4, %v2415_v5, 0.0 }
0x12e7   :  { %v2131_v55 = vpop.xlane.xlu0 %2130 }
0x12e8   :  { %v2133_v30 = vmul.f32 0.03125, %v2131_v55 }
0x12e9   :  { %v2128_v50 = vpop.xlane.xlu1 %2127 }
0x12ea   :  { %v3709_v19 = vsub.f32 %v2123_v16, %v2133_v30  ;;  %v2132_v52 = vmul.f32 0.03125, %v2128_v50 }
0x12eb   :  { %v2273_v20 = vpop.xlane.xlu0 %2272 }
0x12ec   :  { %v3711_v33 = vsub.f32 %v2122_v35, %v2132_v52  ;;  %v2274_v21 = vrot.slane %v2273_v20, 4  ;;  %v2137_v56 = vmul.f32 %v3709_v19, %v3709_v19 }
0x12ed   :  { %v2254_v58 = vpop.xlane.xlu1 %2253 }
0x12ee   :  { %v2275_v61 = vadd.f32 %v2274_v21, %v2273_v20  ;;  %v2255_v62 = vrot.slane %v2254_v58, 4  ;;  %v2141_v44 = vsel %vm162_vm7, %v2137_v56, 0.0  ;;  %v2136_v59 = vmul.f32 %v3711_v33, %v3711_v33 }
0x12ef   :  { %2142 = vadd.xlane.f32.xlu0 %v2141_v44  ;;  %v2374_v63 = vpop.xlane.xlu0 %2373 }
0x12f0   :  { %v2276_v1 = vrot.slane %v2275_v61, 2  ;;  %v2256_v2 = vadd.f32 %v2255_v62, %v2254_v58  ;;  %v2375_v46 = vrot.slane %v2374_v63, 4  ;;  %v2138_v57 = vsel %vm162_vm7, %v2136_v59, 0.0 }
0x12f1   :  { %2139 = vadd.xlane.f32.xlu1 %v2138_v57  ;;  %v2356_v49 = vpop.xlane.xlu1 %2355 }
0x12f2   :  { %v2257_v51 = vrot.slane %v2256_v2, 2  ;;  %v2376_v6 = vadd.f32 %v2375_v46, %v2374_v63  ;;  %v2357_v3 = vrot.slane %v2356_v49, 4  ;;  %v2277_v11 = vadd.f32 %v2276_v1, %v2275_v61 }
0x12f4   :  { %v2377_v7 = vrot.slane %v2376_v6, 2  ;;  %v2358_v53 = vadd.f32 %v2357_v3, %v2356_v49  ;;  %v2258_v12 = vadd.f32 %v2257_v51, %v2256_v2  ;;  %v2278_v14 = vrot.slane %v2277_v11, 1 }
0x12f5   :  { %2419 = vadd.xlane.f32.xlu1 %v2418_v36 }
0x12f6   :  { %v2359_v15 = vrot.slane %v2358_v53, 2  ;;  %v2259_v16 = vrot.slane %v2258_v12, 1  ;;  %v2378_v10 = vadd.f32 %v2377_v7, %v2376_v6  ;;  %v2279_v39 = vadd.f32 %v2278_v14, %v2277_v11 }
0x12f8   :  { %v2260_v17 = vadd.f32 %v2259_v16, %v2258_v12  ;;  %v2360_v35 = vadd.f32 %v2359_v15, %v2358_v53  ;;  %v2379_v18 = vrot.slane %v2378_v10, 1 }
0x12fa   :  { %2821 = vpush %v2260_v17  ;;  %v2361_v22 = vrot.slane %v2360_v35, 1  ;;  %v2380_v31 = vadd.f32 %v2379_v18, %v2378_v10 }
0x12fb   :  { %2823 = vpush %v2279_v39 }
0x12fc   :  { %v2362_v34 = vadd.f32 %v2361_v22, %v2360_v35 }
0x12fe   :  { %2825 = vpush %v2362_v34 }
0x12ff   :  { %2827 = vpush %v2380_v31 }
0x1300   :  { %2941 = shalt.err (!%p2938_p4)
}
0x1301   :  { %s2980_s18 = smov 128   ;;  %s2981_s10 = smov 8   ;;  %vm2391_vm0 = vcmask 0  }
0x1302   :  { %2442 = dma.vmem_to_hbm [thread:$0]  %s2437_s3, 256, %s3771_s26, [#allocation3], %s2980_s18, %s2980_s18, %s2981_s10  }
0x1303   :  { %s2982_s15 = smov [#allocation4]  }
0x1304   :  { %s2449_s9 = sshll.u32 %s2982_s15, 4  ;;  %s2450_s9 = int_to_ptr.vmem [resolvable:$true] %s2449_s9 }
0x1305   :  { %s2950_s11 = scalar_lea.vmem %s2450_s9, 16  ;;  %s2954_s29 = scalar_lea.vmem %s2450_s9, 32 }
0x1306   :  { %p2951_p5 = scmp.ne.s32.totalorder %s2450_s9, %s2950_s11  ;;  %p2955_p6 = scmp.lt.s32.totalorder %s2450_s9, %s2450_s9 }
0x1307   :  { %p2956_p7 = scmp.lt.s32.totalorder %s2954_s29, %s2950_s11 }
0x1309   :  { %p2957_p8 = por %p2956_p7, %p2955_p6 }
0x130b   :  { %p2958_p9 = pnand %p2957_p8, %p2951_p5 }
0x132b   :  { %s2822_s14 = spop %2821 }
0x132c   :  { %s2824_s0 = spop %2823 }
0x132f   :  { %s2826_s4 = spop %2825 }
0x1330   :  { %s2364_s2 = sadd.f32 %s2826_s4, %s2822_s14  ;;  %s2828_s7 = spop %2827 }
0x1331   :  { %s2382_s6 = sadd.f32 %s2828_s7, %s2824_s0 }
0x1332   :  { %s2385_s30 = smul.f32 0.0625, %s2364_s2 }
0x1333   :  { %s2388_s12 = smul.f32 0.05, %s2382_s6 }
0x1335   :  { %s2389_s25 = ssub.f32 %s2385_s30, %s2388_s12 }
0x1337   :  { %v2390_v8 = vstv %s2389_s25 }
0x1338   :  { %2392 = vst.msk [vmem:[#allocation4] sm:$0x1] %vm2391_vm0, %v2390_v8 }
0x1339   :  { %2961 = shalt.err (!%p2958_p9)
}
0x133a   :  { %2452 = dma.vmem_to_hbm [thread:$0]  %s2450_s9, 16, %s3772_s27, [#allocation5]   ;;  %vm2421_vm5 = vcmask 1024   ;;  %v2536_v40 = vld [vmem:[%s3767_s22] ss:$0 sm:$0xff] }
0x133b   :  { %v2537_v41 = vld [vmem:[%s3768_s23] ss:$0 sm:$0xff] }
0x1378   :  { %v2143_v29 = vpop.xlane.xlu0 %2142 }
0x1379   :  { %v2145_v13 = vmul.f32 0.03125, %v2143_v29 }
0x137a   :  { %v2140_v32 = vpop.xlane.xlu1 %2139 }
0x137b   :  { %v2147_v4 = vadd.f32 1e-06, %v2145_v13  ;;  %v2144_v37 = vmul.f32 0.03125, %v2140_v32 }
0x137d   :  { %2922 = vrsqrt.f32 %v2147_v4  ;;  %v2146_v38 = vadd.f32 1e-06, %v2144_v37 }
0x137e   :  { %v2420_v26 = vpop.xlane.xlu1 %2419 }
0x137f   :  { %2924 = vrsqrt.f32 %v2146_v38  ;;  %2422 = vst.msk [vmem:[%s3773_s28] sm:$0x3] %vm2421_vm5, %v2420_v26 }
0x138a   :  { %v2923_v24 = vpop.eup %2922 }
0x138b   :  { %v2151_v23 = vmul.f32 %v2923_v24, %v3709_v19 }
0x138c   :  { %v2925_v25 = vpop.eup %2924 }
0x138d   :  { %v2159_v27 = vmul.f32 %v2536_v40, %v2151_v23  ;;  %v2150_v9 = vmul.f32 %v2925_v25, %v3711_v33 }
0x138f   :  { %v2167_v43 = vadd.f32 %v2537_v41, %v2159_v27  ;;  %v2158_v28 = vmul.f32 %v2536_v40, %v2150_v9 }
0x1391   :  { %2424 = vst.msk [vmem:[%s3769_s24 + $0x8] sm:$0xff] %vm162_vm7, %v2167_v43  ;;  %v2166_v45 = vadd.f32 %v2537_v41, %v2158_v28 }
0x1393   :  { %2423 = vst.msk [vmem:[%s3769_s24] sm:$0xff] %vm162_vm7, %v2166_v45 }
0x1394   :  { %2970 = dma.done.wait [#allocation3], 256  }
0x1395   :  { %2971 = vsyncadd [#allocation3], 4294967040 }
0x1396   :  { %2972 = dma.done.wait [#allocation5], 16  }
0x1397   :  { %2973 = vsyncadd [#allocation5], 4294967280 }
0x1398   :  { %2467 = vsyncpa [#allocation3], 1 }
0x1399   :  { %2468 = vsyncpa [#allocation5], 1 }

</bundles_post_ra>
